<compile_context>
chip_gen: v5e
topology: v5e:2x2
jax: 0.10.0
libtpu: 0.0.40
codegen_flags: <defaults>
</compile_context>

<pallas_src>
import functools

import numpy as np
import jax
import jax.numpy as jnp
from jax import lax
from jax.experimental import pallas as pl
from jax.experimental.pallas import tpu as pltpu


def _selector_kernel(num_valid_ref,      # SMEM (Bp,) int32   (scalar prefetch)
                     img_ref,            # VMEM (VB*FP, Di)   bf16
                     txt_ref,            # VMEM (VB, 1, P)    f32 (pre-normalized)
                     wv_ref,             # VMEM (Di, P)       bf16 (grid-resident)
                     slab_ref,           # VMEM (VB, 8, FP)   f32  out
                     emb_ref,            # VMEM (VB*FP, P)    bf16 out
                     *, max_frame_num, videos_per_block, frame_pad):
    VB, FP = videos_per_block, frame_pad
    g = pl.program_id(0)

    # CLIP visual projection head (bias-free Linear). LHS stacks VB videos so
    # the MXU sees M = VB*FP rows; bf16 operands, f32 accumulation.
    img_emb = jnp.dot(img_ref[...], wv_ref[...],
                      preferred_element_type=jnp.float32)        # (VB*FP, P) f32

    # Store embeddings immediately so the VMEM writeback streams on the vst
    # slot underneath the following VPU/XLU rank math instead of serializing
    # at the end (and shortens img_emb's live range).
    emb_ref[...] = img_emb.astype(emb_ref.dtype)

    p = img_emb.shape[1]
    contract_last = (((1,), (1,)), ((), ()))            # contract last dims
    ones_row = jnp.ones((1, p), jnp.float32)
    eps = jnp.float32(1e-12)                 # matches F.normalize default eps
    sub_i = lax.broadcasted_iota(jnp.int32, (8, FP), 0)
    lane_i = lax.broadcasted_iota(jnp.int32, (1, FP), 1)
    i_lane = lax.broadcasted_iota(jnp.int32, (FP, FP), 1)
    j_sub = lax.broadcasted_iota(jnp.int32, (FP, FP), 0)

    for v in range(VB):                      # VB is tiny & static (unrolled)
        emb_v = img_emb[v * FP:(v + 1) * FP, :]          # (FP, P) f32, tile-aligned
        txt_v = txt_ref[v].astype(jnp.float32)           # (1, P)  f32

        # f2t cosine, lane-major (frames on the LANE axis):
        #   raw[f]   = txt_n . emb[f]            (tiny M=1 MXU matvec, HIGHEST)
        #   sumsq[f] = sum_p emb[f,p]^2          (ones matvec -> stays lane-major)
        #   f2t[f]   = raw[f] * rsqrt(max(sumsq[f], eps^2))     (rsqrt -> EUP slot)
        raw_row = lax.dot_general(txt_v, emb_v, contract_last,
                                  precision=lax.Precision.HIGHEST,
                                  preferred_element_type=jnp.float32)     # (1, FP)
        sumsq_row = lax.dot_general(ones_row, emb_v * emb_v, contract_last,
                                    precision=lax.Precision.HIGHEST,
                                    preferred_element_type=jnp.float32)   # (1, FP)
        inv_norm = lax.rsqrt(jnp.maximum(sumsq_row, eps * eps))
        f2t_row = raw_row * inv_norm                                      # (1, FP)

        # Padded frames and NaN scores never enter the ranking (PyTorch's
        # `score > -100` cluster-top gate also never admits NaN).
        nv = num_valid_ref[g * VB + v]                   # SMEM scalar read
        selectable = jnp.logical_and(lane_i < nv, f2t_row == f2t_row)
        s_row = jnp.where(selectable, f2t_row, jnp.float32(-3.0))         # (1, FP)
        # One small XLU shuffle; single source of truth keeps ties exact.
        s_col = jnp.transpose(s_row)                                      # (FP, 1)

        # rank_i = #{j: s_j > s_i} + #{j: s_j == s_i and j < i}
        # Compare matrix is [j (sublane), i (lane)] so the sublane sum yields
        # the rank directly as a lane-major row (no output transpose).
        better = s_col > s_row
        tie_earlier = jnp.logical_and(s_col == s_row, j_sub < i_lane)
        rank_row = jnp.sum(jnp.logical_or(better, tie_earlier).astype(jnp.int32),
                           axis=0, keepdims=True)                         # (1, FP)
        sel_row = jnp.logical_and(rank_row < max_frame_num, selectable)

        # Pack lane-dense results into one (8, FP=128) slab per video:
        #   row 0 = f2t scores (f32), row 1 = selected flag (0.0 / 1.0).
        f2t_b = jnp.broadcast_to(f2t_row, (8, FP))
        sel_b = jnp.broadcast_to(sel_row.astype(jnp.float32), (8, FP))
        slab_ref[v] = jnp.where(sub_i == 0, f2t_b,
                                jnp.where(sub_i == 1, sel_b, jnp.float32(0.0)))


def cluster_frame_selector_forward(img_feats, txt_feats, w_visual, w_text,
                                   num_frames, *, cluster_num=64,
                                   max_frame_num=32, frame_pad=128,
                                   videos_per_block=2,
                                   emb_dtype=jnp.bfloat16):
    """Batched ClusterFrameSelector forward (identity-cluster-label branch).

    img_feats : (B, F_in, D_img)   per-video pooled CLIP image features
    txt_feats : (B, D_txt)         one text query per video
    w_visual  : (D_img, P)         CLIP visual_projection weight ([D_in, P])
    w_text    : (D_txt, P)         CLIP text_projection weight
    num_frames: python sequence of B ints (valid frames per video)

    Returns padded (is_selected[B, frame_pad] int32, f2t[B, frame_pad] f32,
    img_embs[B, frame_pad, P] emb_dtype); valid entries are [:num_frames[b]].
    """
    B, F_in, Di = img_feats.shape
    P = w_visual.shape[1]
    num_frames = [int(n) for n in num_frames]
    assert len(num_frames) == B and max(num_frames) <= min(F_in, frame_pad)
    # TODO(synk): KMeans clustering path (frame_num > cluster_num) has no clean
    # Pallas equivalent; only the identity-label branch of cluster() is handled.
    assert max(num_frames) <= cluster_num

    VB, FP = videos_per_block, frame_pad
    Bp = ((B + VB - 1) // VB) * VB
    G = Bp // VB

    # Query-invariant text side hoisted out of the kernel (plain JAX):
    # CLIP text projection + L2 normalization (eps = 1e-12, like F.normalize).
    txt_emb = jnp.dot(txt_feats.astype(jnp.float32), w_text.astype(jnp.float32),
                      precision=lax.Precision.HIGHEST)                   # (B, P)
    txt_norm = jnp.sqrt(jnp.sum(txt_emb * txt_emb, axis=-1, keepdims=True))
    txt_n = txt_emb / jnp.maximum(txt_norm, jnp.float32(1e-12))
    txt_n = jnp.pad(txt_n, ((0, Bp - B), (0, 0))).reshape(Bp, 1, P)

    # Fixed-FP frame padding (one compiled shape for any F; lane-dense),
    # batch padded to a multiple of videos_per_block; bf16 heavy operands.
    img = jnp.pad(img_feats, ((0, Bp - B), (0, FP - F_in), (0, 0)))
    img = img.reshape(Bp * FP, Di).astype(jnp.bfloat16)
    wv = w_visual.astype(jnp.bfloat16)
    nvalid = jnp.array(num_frames + [0] * (Bp - B), dtype=jnp.int32)

    kernel = functools.partial(_selector_kernel, max_frame_num=max_frame_num,
                               videos_per_block=VB, frame_pad=FP)

    emb_bytes = jnp.dtype(emb_dtype).itemsize
    cost = pl.CostEstimate(
        flops=2 * Bp * FP * P * (Di + 2),
        transcendentals=Bp * FP,
        bytes_accessed=(Di * P * 2 + Bp * FP * Di * 2 + Bp * P * 4
                        + Bp * FP * P * emb_bytes + Bp * 8 * FP * 4))

    # Working set per grid step (resident bf16 weight + double-buffered img/emb
    # blocks) is well under the scoped VMEM default on v5e/v6e/v7x, so no
    # vmem_limit_bytes override is needed even at real CLIP sizes.
    slab, emb = pl.pallas_call(
        kernel,
        out_shape=(
            jax.ShapeDtypeStruct((Bp, 8, FP), jnp.float32),   # packed f2t + selected
            jax.ShapeDtypeStruct((Bp * FP, P), emb_dtype),    # image embeddings
        ),
        grid_spec=pltpu.PrefetchScalarGridSpec(
            num_scalar_prefetch=1,
            grid=(G,),
            in_specs=[
                # VB*FP stacked frame rows per grid step -> MXU M = VB*FP.
                pl.BlockSpec((VB * FP, Di), lambda g, nv: (g, 0)),
                pl.BlockSpec((VB, 1, P), lambda g, nv: (g, 0, 0)),
                # Constant block index -> weight DMA'd once, stays VMEM-resident.
                pl.BlockSpec((Di, P), lambda g, nv: (0, 0)),
            ],
            out_specs=(
                pl.BlockSpec((VB, 8, FP), lambda g, nv: (g, 0, 0)),
                pl.BlockSpec((VB * FP, P), lambda g, nv: (g, 0)),
            ),
        ),
        compiler_params=pltpu.CompilerParams(
            # Independent batch axis: shards grid steps across both TCs on v7x.
            dimension_semantics=("parallel",)),
        cost_estimate=cost,
    )(nvalid, img, txt_n, wv)

    f2t_scores = slab[:B, 0, :]                      # (B, FP) f32
    is_selected = slab[:B, 1, :].astype(jnp.int32)   # (B, FP) int32
    img_embs = emb.reshape(Bp, FP, P)[:B]            # (B, FP, P) emb_dtype
    return is_selected, f2t_scores, img_embs


if __name__ == "__main__":
    # Small, deterministic synthetic problem:
    #   B videos with varying valid frame counts, image hidden Di, text hidden
    #   Dt, CLIP projection dim P.
    B, F_in, Di, Dt, P = 4, 8, 32, 32, 16
    cluster_num = 64      # >= every F -> identity cluster labels (exact branch)
    max_frame_num = 4     # select top-4 frames by f2t cosine score per video
    num_frames = [8, 5, 7, 3]

    key = jax.random.PRNGKey(0)
    k1, k2, k3, k4 = jax.random.split(key, 4)
    img_feats = jax.random.normal(k1, (B, F_in, Di), dtype=jnp.float32)
    txt_feats = jax.random.normal(k2, (B, Dt), dtype=jnp.float32)
    # Deterministic synthetic CLIP projection weights (visual_projection /
    # text_projection are bias-free Linear layers in CLIPModel).
    w_visual = 0.02 * jax.random.normal(k3, (Di, P), dtype=jnp.float32)
    w_text = 0.02 * jax.random.normal(k4, (Dt, P), dtype=jnp.float32)

    is_sel, f2t, embs = cluster_frame_selector_forward(
        img_feats, txt_feats, w_visual, w_text, num_frames,
        cluster_num=cluster_num, max_frame_num=max_frame_num)
    jax.block_until_ready((is_sel, f2t, embs))

    # Shape / dtype checks (outputs are frame-padded to 128).
    assert is_sel.shape == (B, 128) and is_sel.dtype == jnp.int32
    assert f2t.shape == (B, 128) and f2t.dtype == jnp.float32
    assert embs.shape == (B, 128, P)

    for b in range(B):
        Fb = num_frames[b]
        sel_b = np.asarray(is_sel[b, :Fb])
        f2t_b = np.asarray(f2t[b, :Fb], dtype=np.float32)
        emb_b = np.asarray(embs[b, :Fb].astype(jnp.float32))

        # Numerical sanity vs a plain-numpy f32 reference of the same math.
        ref_emb = np.asarray(img_feats[b, :Fb]) @ np.asarray(w_visual)
        ref_txt = np.asarray(txt_feats[b:b + 1]) @ np.asarray(w_text)
        ref_imn = ref_emb / np.maximum(
            np.linalg.norm(ref_emb, axis=-1, keepdims=True), 1e-12)
        ref_txn = ref_txt / np.maximum(
            np.linalg.norm(ref_txt, axis=-1, keepdims=True), 1e-12)
        ref_f2t = (ref_imn * ref_txn).sum(-1)

        assert np.allclose(f2t_b, ref_f2t, rtol=2e-2, atol=2e-2)
        assert np.allclose(emb_b, ref_emb, rtol=2e-2, atol=2e-2)

        # Selection logic check: top-k of the kernel's own scores, stable ties.
        k = min(max_frame_num, Fb)
        order = np.argsort(-f2t_b, kind="stable")
        expect = np.zeros((Fb,), np.int32)
        expect[order[:k]] = 1
        assert int(sel_b.sum()) == k
        assert np.array_equal(expect, sel_b)

    print("KERNEL_OK")
</pallas_src>

<mosaic_0001>
module attributes {stable_mosaic.version = 11 : i64} {
  func.func @_selector_kernel(%arg0: i32, %arg1: memref<4xi32, #tpu.memory_space<smem>>, %arg2: memref<256x32xbf16, #tpu.memory_space<vmem>>, %arg3: memref<2x1x16xf32, #tpu.memory_space<vmem>>, %arg4: memref<32x16xbf16, #tpu.memory_space<vmem>>, %arg5: memref<2x8x128xf32, #tpu.memory_space<vmem>>, %arg6: memref<256x16xbf16, #tpu.memory_space<vmem>>) attributes {dimension_semantics = [#tpu.dimension_semantics<parallel>], iteration_bounds = array<i64: 2>, scalar_prefetch = 1 : i64, scratch_operands = 0 : i64, tpu.core_type = #tpu.core_type<tc>, window_params = [{transform_indices = @transform_0, window_bounds = array<i64: 256, 32>}, {transform_indices = @transform_1, window_bounds = array<i64: 2, 1, 16>}, {pipeline_mode = #tpu.pipeline_mode<synchronous>, transform_indices = @transform_2, window_bounds = array<i64: 32, 16>}, {transform_indices = @transform_3, window_bounds = array<i64: 2, 8, 128>}, {transform_indices = @transform_4, window_bounds = array<i64: 256, 16>}]} {
    %c0 = arith.constant 0 : index
    %c0_0 = arith.constant 0 : index
    %0 = vector.load %arg2[%c0, %c0_0] : memref<256x32xbf16, #tpu.memory_space<vmem>>, vector<256x32xbf16>
    %c0_1 = arith.constant 0 : index
    %c0_2 = arith.constant 0 : index
    %1 = vector.load %arg4[%c0_1, %c0_2] : memref<32x16xbf16, #tpu.memory_space<vmem>>, vector<32x16xbf16>
    %cst = arith.constant dense<0.000000e+00> : vector<256x16xf32>
    %2 = tpu.matmul %0, %1, %cst {dimension_numbers = #tpu.dot_dimension_numbers<[1], [0], [0], [1], [0, 0, 1, 1], [], []>} : vector<256x32xbf16>, vector<32x16xbf16>, vector<256x16xf32> -> vector<256x16xf32>
    %3 = arith.truncf %2 : vector<256x16xf32> to vector<256x16xbf16>
    %c0_3 = arith.constant 0 : index
    %c0_4 = arith.constant 0 : index
    %4 = vector.load %arg6[%c0_3, %c0_4] : memref<256x16xbf16, #tpu.memory_space<vmem>>, vector<256x16xbf16>
    tpu.vector_store %arg6[%c0_3, %c0_4], %3 {strides = array<i32>} : memref<256x16xbf16, #tpu.memory_space<vmem>>, vector<256x16xbf16>,
    %cst_5 = arith.constant 1.000000e+00 : f32
    %5 = vector.broadcast %cst_5 : f32 to vector<1x16xf32>
    %6 = tpu.iota {dimensions = array<i32: 0>} : vector<8x128xi32>
    %7 = tpu.iota {dimensions = array<i32: 1>} : vector<1x128xi32>
    %8 = tpu.iota {dimensions = array<i32: 1>} : vector<128x128xi32>
    %9 = tpu.iota {dimensions = array<i32: 0>} : vector<128x128xi32>
    %10 = vector.extract_strided_slice %2 {offsets = [0, 0], sizes = [128, 16], strides = [1, 1]} : vector<256x16xf32> to vector<128x16xf32>
    %c0_6 = arith.constant 0 : index
    %c0_7 = arith.constant 0 : index
    %c0_8 = arith.constant 0 : index
    %11 = vector.load %arg3[%c0_6, %c0_7, %c0_8] : memref<2x1x16xf32, #tpu.memory_space<vmem>>, vector<1x1x16xf32>
    %12 = vector.shape_cast %11 : vector<1x1x16xf32> to vector<1x16xf32>
    %cst_9 = arith.constant dense<0.000000e+00> : vector<1x128xf32>
    %13 = tpu.matmul %12, %10, %cst_9 {dimension_numbers = #tpu.dot_dimension_numbers<[1], [1], [0], [0], [0, 0, 1, 0], [], []>, precision = #tpu.contract_precision<fp32>} : vector<1x16xf32>, vector<128x16xf32>, vector<1x128xf32> -> vector<1x128xf32>
    %14 = arith.mulf %10, %10 : vector<128x16xf32>
    %cst_10 = arith.constant dense<0.000000e+00> : vector<1x128xf32>
    %15 = tpu.matmul %5, %14, %cst_10 {dimension_numbers = #tpu.dot_dimension_numbers<[1], [1], [0], [0], [0, 0, 1, 0], [], []>, precision = #tpu.contract_precision<fp32>} : vector<1x16xf32>, vector<128x16xf32>, vector<1x128xf32> -> vector<1x128xf32>
    %cst_11 = arith.constant 9.99999996E-13 : f32
    %cst_12 = arith.constant 9.99999996E-13 : f32
    %16 = arith.mulf %cst_11, %cst_12 : f32
    %17 = vector.broadcast %16 : f32 to vector<1x128xf32>
    %18 = arith.maximumf %15, %17 : vector<1x128xf32>
    %19 = math.rsqrt %18 : vector<1x128xf32>
    %20 = arith.mulf %13, %19 : vector<1x128xf32>
    %c2_i32 = arith.constant 2 : i32
    %21 = arith.muli %arg0, %c2_i32 : i32
    %c0_i32 = arith.constant 0 : i32
    %22 = arith.addi %21, %c0_i32 : i32
    %23 = arith.index_cast %22 : i32 to index
    %24 = memref.load %arg1[%23] : memref<4xi32, #tpu.memory_space<smem>>
    %25 = vector.broadcast %24 : i32 to vector<1x128xi32>
    %26 = arith.cmpi slt, %7, %25 : vector<1x128xi32>
    %27 = arith.cmpf oeq, %20, %20 : vector<1x128xf32>
    %28 = arith.andi %26, %27 : vector<1x128xi1>
    %cst_13 = arith.constant -3.000000e+00 : f32
    %29 = vector.broadcast %cst_13 : f32 to vector<1x128xf32>
    %30 = arith.select %28, %20, %29 : vector<1x128xi1>, vector<1x128xf32>
    %31 = tpu.transpose %30, [1, 0] : vector<1x128xf32> -> vector<128x1xf32>
    %32 = vector.broadcast %31 : vector<128x1xf32> to vector<128x128xf32>
    %33 = vector.broadcast %30 : vector<1x128xf32> to vector<128x128xf32>
    %34 = arith.cmpf ogt, %32, %33 : vector<128x128xf32>
    %35 = vector.broadcast %31 : vector<128x1xf32> to vector<128x128xf32>
    %36 = vector.broadcast %30 : vector<1x128xf32> to vector<128x128xf32>
    %37 = arith.cmpf oeq, %35, %36 : vector<128x128xf32>
    %38 = arith.cmpi slt, %9, %8 : vector<128x128xi32>
    %39 = arith.andi %37, %38 : vector<128x128xi1>
    %40 = arith.ori %34, %39 : vector<128x128xi1>
    %41 = arith.extui %40 : vector<128x128xi1> to vector<128x128xi32>
    %cst_14 = arith.constant dense<0> : vector<128xi32>
    %42 = vector.multi_reduction <add>, %41, %cst_14 [0] : vector<128x128xi32> to vector<128xi32>
    %43 = vector.shape_cast %42 : vector<128xi32> to vector<1x128xi32>
    %c4_i32 = arith.constant 4 : i32
    %44 = vector.broadcast %c4_i32 : i32 to vector<1x128xi32>
    %45 = arith.cmpi slt, %43, %44 : vector<1x128xi32>
    %46 = arith.andi %45, %28 : vector<1x128xi1>
    %47 = vector.shape_cast %20 : vector<1x128xf32> to vector<1x128xf32>
    %48 = vector.broadcast %47 : vector<1x128xf32> to vector<8x128xf32>
    %49 = arith.extui %46 : vector<1x128xi1> to vector<1x128xi32>
    %50 = arith.sitofp %49 : vector<1x128xi32> to vector<1x128xf32>
    %51 = vector.shape_cast %50 : vector<1x128xf32> to vector<1x128xf32>
    %52 = vector.broadcast %51 : vector<1x128xf32> to vector<8x128xf32>
    %c0_i32_15 = arith.constant 0 : i32
    %53 = vector.broadcast %c0_i32_15 : i32 to vector<8x128xi32>
    %54 = arith.cmpi eq, %6, %53 : vector<8x128xi32>
    %c1_i32 = arith.constant 1 : i32
    %55 = vector.broadcast %c1_i32 : i32 to vector<8x128xi32>
    %56 = arith.cmpi eq, %6, %55 : vector<8x128xi32>
    %cst_16 = arith.constant 0.000000e+00 : f32
    %57 = vector.broadcast %cst_16 : f32 to vector<8x128xf32>
    %58 = arith.select %56, %52, %57 : vector<8x128xi1>, vector<8x128xf32>
    %59 = arith.select %54, %48, %58 : vector<8x128xi1>, vector<8x128xf32>
    %c0_17 = arith.constant 0 : index
    %c0_18 = arith.constant 0 : index
    %c0_19 = arith.constant 0 : index
    %60 = vector.load %arg5[%c0_17, %c0_18, %c0_19] : memref<2x8x128xf32, #tpu.memory_space<vmem>>, vector<1x8x128xf32>
    %61 = vector.shape_cast %60 : vector<1x8x128xf32> to vector<8x128xf32>
    %62 = vector.shape_cast %59 : vector<8x128xf32> to vector<1x8x128xf32>
    tpu.vector_store %arg5[%c0_17, %c0_18, %c0_19], %62 {strides = array<i32>} : memref<2x8x128xf32, #tpu.memory_space<vmem>>, vector<1x8x128xf32>,
    %63 = vector.extract_strided_slice %2 {offsets = [128, 0], sizes = [128, 16], strides = [1, 1]} : vector<256x16xf32> to vector<128x16xf32>
    %c1 = arith.constant 1 : index
    %c0_20 = arith.constant 0 : index
    %c0_21 = arith.constant 0 : index
    %64 = vector.load %arg3[%c1, %c0_20, %c0_21] : memref<2x1x16xf32, #tpu.memory_space<vmem>>, vector<1x1x16xf32>
    %65 = vector.shape_cast %64 : vector<1x1x16xf32> to vector<1x16xf32>
    %cst_22 = arith.constant dense<0.000000e+00> : vector<1x128xf32>
    %66 = tpu.matmul %65, %63, %cst_22 {dimension_numbers = #tpu.dot_dimension_numbers<[1], [1], [0], [0], [0, 0, 1, 0], [], []>, precision = #tpu.contract_precision<fp32>} : vector<1x16xf32>, vector<128x16xf32>, vector<1x128xf32> -> vector<1x128xf32>
    %67 = arith.mulf %63, %63 : vector<128x16xf32>
    %cst_23 = arith.constant dense<0.000000e+00> : vector<1x128xf32>
    %68 = tpu.matmul %5, %67, %cst_23 {dimension_numbers = #tpu.dot_dimension_numbers<[1], [1], [0], [0], [0, 0, 1, 0], [], []>, precision = #tpu.contract_precision<fp32>} : vector<1x16xf32>, vector<128x16xf32>, vector<1x128xf32> -> vector<1x128xf32>
    %cst_24 = arith.constant 9.99999996E-13 : f32
    %cst_25 = arith.constant 9.99999996E-13 : f32
    %69 = arith.mulf %cst_24, %cst_25 : f32
    %70 = vector.broadcast %69 : f32 to vector<1x128xf32>
    %71 = arith.maximumf %68, %70 : vector<1x128xf32>
    %72 = math.rsqrt %71 : vector<1x128xf32>
    %73 = arith.mulf %66, %72 : vector<1x128xf32>
    %c2_i32_26 = arith.constant 2 : i32
    %74 = arith.muli %arg0, %c2_i32_26 : i32
    %c1_i32_27 = arith.constant 1 : i32
    %75 = arith.addi %74, %c1_i32_27 : i32
    %76 = arith.index_cast %75 : i32 to index
    %77 = memref.load %arg1[%76] : memref<4xi32, #tpu.memory_space<smem>>
    %78 = vector.broadcast %77 : i32 to vector<1x128xi32>
    %79 = arith.cmpi slt, %7, %78 : vector<1x128xi32>
    %80 = arith.cmpf oeq, %73, %73 : vector<1x128xf32>
    %81 = arith.andi %79, %80 : vector<1x128xi1>
    %cst_28 = arith.constant -3.000000e+00 : f32
    %82 = vector.broadcast %cst_28 : f32 to vector<1x128xf32>
    %83 = arith.select %81, %73, %82 : vector<1x128xi1>, vector<1x128xf32>
    %84 = tpu.transpose %83, [1, 0] : vector<1x128xf32> -> vector<128x1xf32>
    %85 = vector.broadcast %84 : vector<128x1xf32> to vector<128x128xf32>
    %86 = vector.broadcast %83 : vector<1x128xf32> to vector<128x128xf32>
    %87 = arith.cmpf ogt, %85, %86 : vector<128x128xf32>
    %88 = vector.broadcast %84 : vector<128x1xf32> to vector<128x128xf32>
    %89 = vector.broadcast %83 : vector<1x128xf32> to vector<128x128xf32>
    %90 = arith.cmpf oeq, %88, %89 : vector<128x128xf32>
    %91 = arith.cmpi slt, %9, %8 : vector<128x128xi32>
    %92 = arith.andi %90, %91 : vector<128x128xi1>
    %93 = arith.ori %87, %92 : vector<128x128xi1>
    %94 = arith.extui %93 : vector<128x128xi1> to vector<128x128xi32>
    %cst_29 = arith.constant dense<0> : vector<128xi32>
    %95 = vector.multi_reduction <add>, %94, %cst_29 [0] : vector<128x128xi32> to vector<128xi32>
    %96 = vector.shape_cast %95 : vector<128xi32> to vector<1x128xi32>
    %c4_i32_30 = arith.constant 4 : i32
    %97 = vector.broadcast %c4_i32_30 : i32 to vector<1x128xi32>
    %98 = arith.cmpi slt, %96, %97 : vector<1x128xi32>
    %99 = arith.andi %98, %81 : vector<1x128xi1>
    %100 = vector.shape_cast %73 : vector<1x128xf32> to vector<1x128xf32>
    %101 = vector.broadcast %100 : vector<1x128xf32> to vector<8x128xf32>
    %102 = arith.extui %99 : vector<1x128xi1> to vector<1x128xi32>
    %103 = arith.sitofp %102 : vector<1x128xi32> to vector<1x128xf32>
    %104 = vector.shape_cast %103 : vector<1x128xf32> to vector<1x128xf32>
    %105 = vector.broadcast %104 : vector<1x128xf32> to vector<8x128xf32>
    %c0_i32_31 = arith.constant 0 : i32
    %106 = vector.broadcast %c0_i32_31 : i32 to vector<8x128xi32>
    %107 = arith.cmpi eq, %6, %106 : vector<8x128xi32>
    %c1_i32_32 = arith.constant 1 : i32
    %108 = vector.broadcast %c1_i32_32 : i32 to vector<8x128xi32>
    %109 = arith.cmpi eq, %6, %108 : vector<8x128xi32>
    %cst_33 = arith.constant 0.000000e+00 : f32
    %110 = vector.broadcast %cst_33 : f32 to vector<8x128xf32>
    %111 = arith.select %109, %105, %110 : vector<8x128xi1>, vector<8x128xf32>
    %112 = arith.select %107, %101, %111 : vector<8x128xi1>, vector<8x128xf32>
    %c1_34 = arith.constant 1 : index
    %c0_35 = arith.constant 0 : index
    %c0_36 = arith.constant 0 : index
    %113 = vector.load %arg5[%c1_34, %c0_35, %c0_36] : memref<2x8x128xf32, #tpu.memory_space<vmem>>, vector<1x8x128xf32>
    %114 = vector.shape_cast %113 : vector<1x8x128xf32> to vector<8x128xf32>
    %115 = vector.shape_cast %112 : vector<8x128xf32> to vector<1x8x128xf32>
    tpu.vector_store %arg5[%c1_34, %c0_35, %c0_36], %115 {strides = array<i32>} : memref<2x8x128xf32, #tpu.memory_space<vmem>>, vector<1x8x128xf32>,
    return
  }
  func.func @transform_0(%arg0: i32, %arg1: memref<4xi32, #tpu.memory_space<smem>>) -> (i32, i32) {
    %c0_i32 = arith.constant 0 : i32
    %c0_i32_0 = arith.constant 0 : i32
    return %arg0, %c0_i32 : i32, i32
  }
  func.func @transform_1(%arg0: i32, %arg1: memref<4xi32, #tpu.memory_space<smem>>) -> (i32, i32, i32) {
    %c0_i32 = arith.constant 0 : i32
    %c0_i32_0 = arith.constant 0 : i32
    %c0_i32_1 = arith.constant 0 : i32
    return %arg0, %c0_i32, %c0_i32_0 : i32, i32, i32
  }
  func.func @transform_2(%arg0: i32, %arg1: memref<4xi32, #tpu.memory_space<smem>>) -> (i32, i32) {
    %c0_i32 = arith.constant 0 : i32
    %c0_i32_0 = arith.constant 0 : i32
    %c0_i32_1 = arith.constant 0 : i32
    return %c0_i32, %c0_i32_0 : i32, i32
  }
  func.func @transform_3(%arg0: i32, %arg1: memref<4xi32, #tpu.memory_space<smem>>) -> (i32, i32, i32) {
    %c0_i32 = arith.constant 0 : i32
    %c0_i32_0 = arith.constant 0 : i32
    %c0_i32_1 = arith.constant 0 : i32
    return %arg0, %c0_i32, %c0_i32_0 : i32, i32, i32
  }
  func.func @transform_4(%arg0: i32, %arg1: memref<4xi32, #tpu.memory_space<smem>>) -> (i32, i32) {
    %c0_i32 = arith.constant 0 : i32
    %c0_i32_0 = arith.constant 0 : i32
    return %arg0, %c0_i32 : i32, i32
  }
}

</mosaic_0001>

<bundles_post_ra>
// kernel: tpu_custom_call.1
= control target key start
LH: loop header
LB: loop body
LE: loop exit
PB: predicated region body
PF: predicated region fallthrough
CT: control target
= control target key end

     0   :  { %s3080_s21 = smov [#allocation3]   ;;  %s5111_s0 = inlined_call_operand.vmem [shape: s32[4], index: 0, kind: input, shape index: {}]   ;;  %s5112_s1 = inlined_call_operand.vmem [shape: bf16[512,32], index: 1, kind: input, shape index: {}]   ;;  %s5113_s2 = inlined_call_operand.vmem [shape: f32[4,1,16], index: 2, kind: input, shape index: {}]   ;;  %s5114_s3 = inlined_call_operand.vmem [shape: bf16[32,16], index: 3, kind: input, shape index: {}]   ;;  %s5115_s4 = inlined_call_operand.hbm [shape: f32[4,8,128], index: 4, kind: output, shape index: {0}]   ;;  %s5116_s5 = inlined_call_operand.vmem [shape: bf16[512,16], index: 5, kind: output, shape index: {1}]  }
   0x1   :  { %s12_s20 = sshll.u32 %s5111_s0, 4  ;;  %s13_s20 = int_to_ptr.vmem [resolvable:$true] %s12_s20 }
   0x2   :  { %15 = dma.vmem_to_smem %s13_s20, 16, %s3080_s21, [#allocation2] }
   0x3   :  { %3058 = dma.done.wait [#allocation2], 16 }
   0x4   :  { %3059 = vsyncadd [#allocation2], 4294967280 }
   0x5   :  { %18 = sfence }
   0x6   :  { %19 = vsyncpa [#allocation5], 0 }
   0x7   :  { %21 = vsyncpa [#allocation5 + $0x1], 0  ;;  %s3119_s22 = smov 0   ;;  %s3121_s23 = smov 0  }
   0x8   :  { %s3123_s24 = smov 0   ;;  %s3125_s25 = smov 0  }
   0x9 LB: > { %s3140_s0 = sadd.s32 4294967295, %s3078_s25   ;;  %s2817_s26 = sadd.s32 4294967294, %s3078_s25   ;;  %s3078_s25 = sphi %s3125_s25, %s5308_s25   ;;  %s3074_s24 = sphi %s3123_s24, %s5307_s24   ;;  %s3070_s23 = sphi %s3121_s23, %s5306_s23   ;;  %s3066_s22 = sphi %s3119_s22, %s5305_s22  }
   0xa   : > { %s3144_s27 = sadd.s32 1, %s3078_s25   ;;  %s107_s28 = sadd.s32 1, %s3074_s24 }
   0xb   : > { %s104_s29 = ssub.s32 %s3078_s25, %s3144_s27  ;;  %p117_p0 = scmp.ne.s32.totalorder %s3074_s24, %s3070_s23 }
   0xc   : > { %p105_p1 = scmp.eq.s32.totalorder %s104_s29, 0  ;;  %p118_p2 = scmp.eq.s32.totalorder %s3140_s0, 1 }
   0xd   : > { %p123_p3 = scmp.ne.s32.totalorder %s3070_s23, %s3066_s22  ;;  %p124_p4 = scmp.eq.s32.totalorder %s2817_s26, 1 }
   0xe   : > { %s3155_s30 = scalar_select %p105_p1, %s3074_s24, %s107_s28  }
   0xf   : > { %p3157_p5 = por %p118_p2, %p117_p0  ;;  %p3161_p6 = por %p124_p4, %p123_p3 }
  0x10   : > { %p2820_p7 = scmp.ge.s32.totalorder %s3078_s25, 1  ;;  %p188_p8 = scmp.lt.s32.totalorder %s3078_s25, 3 }
  0x12   : > { %p189_p9 = pnand %p2820_p7, %p188_p8 }
  0x14   : > { %192 = sbr.rel (%p189_p9) target bundleno = 1398 (0x576), region = 32 }
  0x19   : > { %v2948_v0 = vld [vmem:[%s5114_s3 + $0x8] sm:$0xff]  ;;  %s2822_s10 = sshll.u32 %s3140_s0, 5  ;;  %v2947_v1 = vld [vmem:[%s5114_s3] sm:$0xff]  ;;  %vm370_vm0 = vcmask 261120   ;;  %vm540_vm1 = vcmask 125952   ;;  %vm593_vm2 = vcmask 130048  }
  0x1a   : > { %p224_p10 = scmp.lt.s32.totalorder %s2822_s10, 63  ;;  %425 = vmatpush.bf16.msra.mxu0 %v2948_v0  ;;  %s3571_s20 = sshll.u32 %s3140_s0, 1 }
  0x1b   : > { %p230_p11 = scmp.lt.s32.totalorder %s3571_s20, 3  ;;  %s1407_s8 = sld [smem:[#allocation3 + %s3571_s20]] }
  0x1c   : > { %s5310_s10 = smov (!%p224_p10, %s2822_s10), 63  ;;  %s2465_s9 = sadd.s32 1, %s3571_s20 }
  0x1d   : > { %s2823_s13 = sshll.u32 %s5310_s10, 2  ;;  %s2466_s10 = sld [smem:[#allocation3 + %s2465_s9]] }
  0x1e   : > { %426 = vmatpush.bf16.msra.mxu0 %v2947_v1  ;;  %s3177_s16 = scalar_lea.vmem %s5112_s1, %s2823_s13  ;;  %s3199_s19 = scalar_lea.vmem %s5116_s5, %s2823_s13 }
  0x1f   : > { %v2931_v2 = vld [vmem:[%s3177_s16] sm:$0xff]  ;;  %v2932_v3 = vld [vmem:[%s3177_s16 + $0x8] sm:$0xff]  ;;  %v2933_v4 = vld [vmem:[%s3177_s16 + $0x10] sm:$0xff]  ;;  %s231_s21 = scalar_select %p230_p11, %s3571_s20, 3 }
  0x20   : > { %v2934_v5 = vld [vmem:[%s3177_s16 + $0x18] sm:$0xff]  ;;  %v2935_v6 = vld [vmem:[%s3177_s16 + $0x20] sm:$0xff]  ;;  %v2936_v7 = vld [vmem:[%s3177_s16 + $0x28] sm:$0xff]  ;;  %s213_s11 = sand.u32 1, %s3070_s23   ;;  %s2949_s14 = sshll.u32 %s3140_s0, 4 }
  0x21   : > { %2899 = vmatmul.msk.bf16.vlgmr.msra.gmra.mxu0 %vm370_vm0, %v2931_v2  ;;  %v2937_v8 = vld [vmem:[%s3177_s16 + $0x30] sm:$0xff]  ;;  %v2938_v9 = vld [vmem:[%s3177_s16 + $0x38] sm:$0xff]  ;;  %v2939_v10 = vld [vmem:[%s3177_s16 + $0x40] sm:$0xff]  ;;  %s3594_s29 = scalar_lea.vmem %s5113_s2, %s231_s21  ;;  %s2821_s12 = sshll.u32 %s213_s11, 4 }
  0x22   : > { %v2940_v15 = vld [vmem:[%s3177_s16 + $0x48] sm:$0xff]  ;;  %v2941_v20 = vld [vmem:[%s3177_s16 + $0x50] sm:$0xff]  ;;  %v2942_v25 = vld [vmem:[%s3177_s16 + $0x58] sm:$0xff]  ;;  %s4983_s13 = scalar_lea.vmem [#allocation4], %s2821_s12  ;;  %s2713_s17 = scalar_lea.hbm %s5115_s4, %s2949_s14 }
  0x23   : > { %v2943_v30 = vld [vmem:[%s3177_s16 + $0x60] sm:$0xff]  ;;  %v2944_v35 = vld [vmem:[%s3177_s16 + $0x68] sm:$0xff]  ;;  %v2945_v40 = vld [vmem:[%s3177_s16 + $0x70] sm:$0xff]  ;;  %s2714_s18 = sshll.u32 %s4983_s13, 4  ;;  %s2697_s0 = scalar_lea.sflag [#allocation5], %s213_s11  ;;  %s2715_s18 = int_to_ptr.vmem [resolvable:$true] %s2714_s18 }
  0x24   : > { %v2946_v45 = vld [vmem:[%s3177_s16 + $0x78] sm:$0xff] }
  0x31   : > { %2900 = vmatmul.msk.bf16.gmra.mxu0 %vm370_vm0, %v2932_v3 }
  0x41   : > { %2901 = vmatmul.msk.bf16.gmra.mxu0 %vm370_vm0, %v2933_v4 }
  0x51   : > { %2902 = vmatmul.msk.bf16.gmra.mxu0 %vm370_vm0, %v2934_v5 }
  0x61   : > { %2903 = vmatmul.msk.bf16.gmra.mxu0 %vm370_vm0, %v2935_v6 }
  0x71   : > { %2904 = vmatmul.msk.bf16.gmra.mxu0 %vm370_vm0, %v2936_v7 }
  0x81   : > { %2905 = vmatmul.msk.bf16.gmra.mxu0 %vm370_vm0, %v2937_v8 }
  0x91   : > { %2906 = vmatmul.msk.bf16.gmra.mxu0 %vm370_vm0, %v2938_v9 }
  0x9e   : > { %v3201_v11 = vpop.f32.mrf.mxu0 }
  0x9f   : > { %v508_v12 = vpack.c.bf16 %v3201_v11, %v3201_v11 }
  0xa1   : > { %541 = vst.msk [vmem:[%s3199_s19] sm:$0xf] %vm540_vm1, %v508_v12  ;;  %2907 = vmatmul.msk.bf16.gmra.mxu0 %vm370_vm0, %v2939_v10 }
  0xa6   : > { %v3208_v13 = vpop.f32.mrf.mxu0 }
  0xa7   : > { %v509_v14 = vpack.c.bf16 %v3208_v13, %v3208_v13 }
  0xa9   : > { %542 = vst.msk [vmem:[%s3199_s19 + $0x4] sm:$0xf] %vm540_vm1, %v509_v14 }
  0xae   : > { %v3215_v16 = vpop.f32.mrf.mxu0 }
  0xaf   : > { %v510_v17 = vpack.c.bf16 %v3215_v16, %v3215_v16 }
  0xb1   : > { %543 = vst.msk [vmem:[%s3199_s19 + $0x8] sm:$0xf] %vm540_vm1, %v510_v17  ;;  %2908 = vmatmul.msk.bf16.gmra.mxu0 %vm370_vm0, %v2940_v15 }
  0xb6   : > { %v3222_v18 = vpop.f32.mrf.mxu0 }
  0xb7   : > { %v511_v19 = vpack.c.bf16 %v3222_v18, %v3222_v18 }
  0xb9   : > { %544 = vst.msk [vmem:[%s3199_s19 + $0xc] sm:$0xf] %vm540_vm1, %v511_v19 }
  0xbe   : > { %v3229_v21 = vpop.f32.mrf.mxu0 }
  0xbf   : > { %v512_v22 = vpack.c.bf16 %v3229_v21, %v3229_v21 }
  0xc1   : > { %545 = vst.msk [vmem:[%s3199_s19 + $0x10] sm:$0xf] %vm540_vm1, %v512_v22  ;;  %2909 = vmatmul.msk.bf16.gmra.mxu0 %vm370_vm0, %v2941_v20 }
  0xc6   : > { %v3236_v23 = vpop.f32.mrf.mxu0 }
  0xc7   : > { %v513_v24 = vpack.c.bf16 %v3236_v23, %v3236_v23 }
  0xc9   : > { %546 = vst.msk [vmem:[%s3199_s19 + $0x14] sm:$0xf] %vm540_vm1, %v513_v24 }
  0xce   : > { %v3243_v26 = vpop.f32.mrf.mxu0 }
  0xcf   : > { %v514_v27 = vpack.c.bf16 %v3243_v26, %v3243_v26 }
  0xd1   : > { %547 = vst.msk [vmem:[%s3199_s19 + $0x18] sm:$0xf] %vm540_vm1, %v514_v27  ;;  %2910 = vmatmul.msk.bf16.gmra.mxu0 %vm370_vm0, %v2942_v25 }
  0xd6   : > { %v3250_v28 = vpop.f32.mrf.mxu0 }
  0xd7   : > { %v515_v29 = vpack.c.bf16 %v3250_v28, %v3250_v28 }
  0xd9   : > { %548 = vst.msk [vmem:[%s3199_s19 + $0x1c] sm:$0xf] %vm540_vm1, %v515_v29 }
  0xde   : > { %v3257_v31 = vpop.f32.mrf.mxu0 }
  0xdf   : > { %v516_v32 = vpack.c.bf16 %v3257_v31, %v3257_v31  ;;  %v622_v20 = vsel %vm593_vm2, %v3257_v31, 0 }
  0xe1   : > { %549 = vst.msk [vmem:[%s3199_s19 + $0x20] sm:$0xf] %vm540_vm1, %v516_v32  ;;  %2911 = vmatmul.msk.bf16.gmra.mxu0 %vm370_vm0, %v2943_v30  ;;  %v619_v32 = vsel %vm593_vm2, %v3250_v28, 0 }
  0xe6   : > { %v3264_v33 = vpop.f32.mrf.mxu0 }
  0xe7   : > { %v517_v34 = vpack.c.bf16 %v3264_v33, %v3264_v33  ;;  %v625_v9 = vsel %vm593_vm2, %v3264_v33, 0 }
  0xe8   : > { %v3383_v22 = vand.u32 4294901760, %v625_v9 }
  0xe9   : > { %550 = vst.msk [vmem:[%s3199_s19 + $0x24] sm:$0xf] %vm540_vm1, %v517_v34  ;;  %v3400_v34 = vand.u32 4294901760, %v622_v20 }
  0xee   : > { %v3271_v36 = vpop.f32.mrf.mxu0 }
  0xef   : > { %v518_v37 = vpack.c.bf16 %v3271_v36, %v3271_v36  ;;  %v628_v2 = vsel %vm593_vm2, %v3271_v36, 0 }
  0xf0   : > { %v3368_v10 = vand.u32 4294901760, %v628_v2 }
  0xf1   : > { %551 = vst.msk [vmem:[%s3199_s19 + $0x28] sm:$0xf] %vm540_vm1, %v518_v37  ;;  %2912 = vmatmul.msk.bf16.gmra.mxu0 %vm370_vm0, %v2944_v35 }
  0xf2   : > { %v3392_v29 = vsub.f32 %v628_v2, %v3368_v10 }
  0xf6   : > { %v3278_v38 = vpop.f32.mrf.mxu0 }
  0xf7   : > { %v519_v39 = vpack.c.bf16 %v3278_v38, %v3278_v38  ;;  %v631_v59 = vsel %vm593_vm2, %v3278_v38, 0 }
  0xf8   : > { %v3351_v3 = vand.u32 4294901760, %v631_v59 }
  0xf9   : > { %552 = vst.msk [vmem:[%s3199_s19 + $0x2c] sm:$0xf] %vm540_vm1, %v519_v39  ;;  %v3407_v39 = vsub.f32 %v625_v9, %v3383_v22  ;;  %v610_v9 = vsel %vm593_vm2, %v3229_v21, 0 }
  0xfa   : > { %v3375_v15 = vsub.f32 %v631_v59, %v3351_v3 }
  0xfc   : > { %v5123_v30 = vand.u32 4294901760, %v3375_v15 }
  0xfe   : > { %v3285_v41 = vpop.f32.mrf.mxu0  ;;  %v713_v37 = vsub.f32 %v3375_v15, %v5123_v30 }
  0xff   : > { %v520_v42 = vpack.c.bf16 %v3285_v41, %v3285_v41  ;;  %v634_v57 = vsel %vm593_vm2, %v3285_v41, 0 }
 0x100   : > { %v3335_v60 = vand.u32 4294901760, %v634_v57 }
 0x101   : > { %553 = vst.msk [vmem:[%s3199_s19 + $0x30] sm:$0xf] %vm540_vm1, %v520_v42  ;;  %2913 = vmatmul.msk.bf16.gmra.mxu0 %vm370_vm0, %v2945_v40  ;;  %v5121_v40 = vand.u32 4294901760, %v3392_v29 }
 0x102   : > { %v3360_v7 = vsub.f32 %v634_v57, %v3335_v60  ;;  %v613_v57 = vsel %vm593_vm2, %v3236_v23, 0 }
 0x104   : > { %v5124_v17 = vand.u32 4294901760, %v3360_v7 }
 0x106   : > { %v3292_v43 = vpop.f32.mrf.mxu0  ;;  %v707_v27 = vsub.f32 %v3360_v7, %v5124_v17 }
 0x107   : > { %v521_v44 = vpack.c.bf16 %v3292_v43, %v3292_v43  ;;  %v637_v50 = vsel %vm593_vm2, %v3292_v43, 0 }
 0x108   : > { %v3318_v54 = vand.u32 4294901760, %v637_v50  ;;  %v708_v35 = vand.u32 4294901760, %v707_v27 }
 0x109   : > { %554 = vst.msk [vmem:[%s3199_s19 + $0x34] sm:$0xf] %vm540_vm1, %v521_v44  ;;  %v616_v44 = vsel %vm593_vm2, %v3243_v26, 0 }
 0x10a   : > { %v3340_v62 = vsub.f32 %v637_v50, %v3318_v54  ;;  %v719_v50 = vsub.f32 %v3392_v29, %v5121_v40  ;;  %v3432_v59 = vand.u32 4294901760, %v616_v44 }
 0x10c   : > { %v5126_v8 = vand.u32 4294901760, %v3340_v62 }
 0x10e   : > { %v3299_v46 = vpop.f32.mrf.mxu0  ;;  %v701_v14 = vsub.f32 %v3340_v62, %v5126_v8 }
 0x10f   : > { %v522_v47 = vpack.c.bf16 %v3299_v46, %v3299_v46  ;;  %v640_v48 = vsel %vm593_vm2, %v3299_v46, 0 }
 0x110   : > { %v3308_v49 = vand.u32 4294901760, %v640_v48  ;;  %v702_v25 = vand.u32 4294901760, %v701_v14 }
 0x111   : > { %555 = vst.msk [vmem:[%s3199_s19 + $0x38] sm:$0xf] %vm540_vm1, %v522_v47  ;;  %2914 = vmatmul.msk.bf16.gmra.mxu0 %vm370_vm0, %v2946_v45  ;;  %v3415_v45 = vand.u32 4294901760, %v619_v32 }
 0x112   : > { %v3323_v56 = vsub.f32 %v640_v48, %v3308_v49  ;;  %v714_v48 = vand.u32 4294901760, %v713_v37 }
 0x114   : > { %v5127_v63 = vand.u32 4294901760, %v3323_v56 }
 0x116   : > { %v3312_v51 = vpop.f32.mrf.mxu0  ;;  %v695_v6 = vsub.f32 %v3323_v56, %v5127_v63 }
 0x117   : > { %v523_v52 = vpack.c.bf16 %v3312_v51, %v3312_v51  ;;  %v643_v53 = vsel %vm593_vm2, %v3312_v51, 0 }
 0x118   : > { %v3320_v55 = vand.u32 4294901760, %v643_v53  ;;  %v696_v12 = vand.u32 4294901760, %v695_v6 }
 0x119   : > { %556 = vst.msk [vmem:[%s3199_s19 + $0x3c] sm:$0xf] %vm540_vm1, %v523_v52  ;;  %v3424_v52 = vsub.f32 %v622_v20, %v3400_v34 }
 0x11a   : > { %646 = vmatpush.xpose.msra.mxu1 %v3320_v55  ;;  %v3331_v58 = vsub.f32 %v643_v53, %v3320_v55  ;;  %v5120_v53 = vand.u32 4294901760, %v3407_v39 }
 0x11c   : > { %789 = vmatpush.xpose.msra.mxu3 %v3331_v58  ;;  %v688_v61 = vand.u32 4294901760, %v3331_v58  ;;  %v725_v2 = vsub.f32 %v3407_v39, %v5120_v53 }
 0x11e   : > { %v3343_v0 = vpop.f32.mrf.mxu0  ;;  %648 = vmatpush.xpose.msra.mxu1 %v3308_v49  ;;  %v689_v1 = vsub.f32 %v3331_v58, %v688_v61  ;;  %v726_v20 = vand.u32 4294901760, %v725_v2 }
 0x11f   : > { %5190 = vst [vmem:[#allocation8_spill] sm:$0xff] %v3343_v0  ;;  %v524_v4 = vpack.c.bf16 %v3343_v0, %v3343_v0 }
 0x120   : > { %792 = vmatpush.xpose.msra.mxu3 %v3323_v56  ;;  %v690_v5 = vand.u32 4294901760, %v689_v1  ;;  %v720_v1 = vand.u32 4294901760, %v719_v50 }
 0x121   : > { %557 = vst.msk [vmem:[%s3199_s19 + $0x40] sm:$0xf] %vm540_vm1, %v524_v4  ;;  %v3439_v4 = vsub.f32 %v619_v32, %v3415_v45  ;;  %v607_v32 = vsel %vm593_vm2, %v3222_v18, 0 }
 0x122   : > { %650 = vmatpush.xpose.msra.mxu1 %v3318_v54  ;;  %691 = vmatpush.xpose.msra.mxu2 %v690_v5  ;;  %v5118_v5 = vand.u32 4294901760, %v3424_v52  ;;  %v3479_v2 = vand.u32 4294901760, %v607_v32 }
 0x123   : > { %v5117_v27 = vand.u32 4294901760, %v3439_v4 }
 0x124   : > { %795 = vmatpush.xpose.msra.mxu3 %v3340_v62 }
 0x126   : > { %v3378_v19 = vpop.f32.mrf.mxu0  ;;  %652 = vmatpush.xpose.msra.mxu1 %v3335_v60  ;;  %697 = vmatpush.xpose.msra.mxu2 %v696_v12  ;;  %v3447_v12 = vand.u32 4294901760, %v613_v57 }
 0x127   : > { %5191 = vst [vmem:[#allocation9_spill] sm:$0xff] %v3378_v19  ;;  %v525_v24 = vpack.c.bf16 %v3378_v19, %v3378_v19 }
 0x128   : > { %798 = vmatpush.xpose.msra.mxu3 %v3360_v7 }
 0x129   : > { %558 = vst.msk [vmem:[%s3199_s19 + $0x44] sm:$0xf] %vm540_vm1, %v525_v24  ;;  %v731_v24 = vsub.f32 %v3424_v52, %v5118_v5 }
 0x12a   : > { %654 = vmatpush.xpose.msra.mxu1 %v3351_v3  ;;  %703 = vmatpush.xpose.msra.mxu2 %v702_v25  ;;  %v3456_v25 = vsub.f32 %v616_v44, %v3432_v59  ;;  %v737_v44 = vsub.f32 %v3439_v4, %v5117_v27  ;;  %v601_v27 = vsel %vm593_vm2, %v3208_v13, 0 }
 0x12b   : > { %v732_v37 = vand.u32 4294901760, %v731_v24  ;;  %v3511_v40 = vand.u32 4294901760, %v601_v27 }
 0x12c   : > { %801 = vmatpush.xpose.msra.mxu3 %v3375_v15 }
 0x12e   : > { %v3410_v42 = vpop.f32.mrf.mxu0  ;;  %656 = vmatpush.xpose.msra.mxu1 %v3368_v10  ;;  %709 = vmatpush.xpose.msra.mxu2 %v708_v35  ;;  %v3464_v35 = vand.u32 4294901760, %v610_v9 }
 0x12f   : > { %5192 = vst [vmem:[#allocation10_spill] sm:$0xff] %v3410_v42  ;;  %v526_v47 = vpack.c.bf16 %v3410_v42, %v3410_v42 }
 0x130   : > { %804 = vmatpush.xpose.msra.mxu3 %v3392_v29  ;;  %v3488_v24 = vsub.f32 %v610_v9, %v3464_v35 }
 0x131   : > { %559 = vst.msk [vmem:[%s3199_s19 + $0x48] sm:$0xf] %vm540_vm1, %v526_v47  ;;  %v3471_v47 = vsub.f32 %v613_v57, %v3447_v12 }
 0x132   : > { %658 = vmatpush.xpose.msra.mxu1 %v3383_v22  ;;  %715 = vmatpush.xpose.msra.mxu2 %v714_v48  ;;  %v5119_v48 = vand.u32 4294901760, %v3456_v25 }
 0x134   : > { %807 = vmatpush.xpose.msra.mxu3 %v3407_v39  ;;  %v743_v57 = vsub.f32 %v3456_v25, %v5119_v48  ;;  %v3503_v48 = vsub.f32 %v607_v32, %v3479_v2 }
 0x136   : > { %v3442_v6 = vpop.f32.mrf.mxu0  ;;  %660 = vmatpush.xpose.msra.mxu1 %v3400_v34  ;;  %721 = vmatpush.xpose.msra.mxu2 %v720_v1  ;;  %v604_v1 = vsel %vm593_vm2, %v3215_v16, 0 }
 0x137   : > { %5193 = vst [vmem:[#allocation11_spill] sm:$0xff] %v3442_v6  ;;  %v527_v14 = vpack.c.bf16 %v3442_v6, %v3442_v6  ;;  %v3496_v5 = vand.u32 4294901760, %v604_v1 }
 0x138   : > { %810 = vmatpush.xpose.msra.mxu3 %v3424_v52 }
 0x139   : > { %560 = vst.msk [vmem:[%s3199_s19 + $0x4c] sm:$0xf] %vm540_vm1, %v527_v14  ;;  %v3520_v30 = vsub.f32 %v604_v1, %v3496_v5  ;;  %v3533_v1 = vsub.f32 %v601_v27, %v3511_v40 }
 0x13a   : > { %662 = vmatpush.xpose.msra.mxu1 %v3415_v45  ;;  %727 = vmatpush.xpose.msra.mxu2 %v726_v20  ;;  %v738_v20 = vand.u32 4294901760, %v737_v44  ;;  %v744_v44 = vand.u32 4294901760, %v743_v57 }
 0x13b   : > { %v5129_v8 = vand.u32 4294901760, %v3520_v30 }
 0x13c   : > { %813 = vmatpush.xpose.msra.mxu3 %v3439_v4 }
 0x13e   : > { %v3474_v50 = vpop.f32.mrf.mxu0  ;;  %664 = vmatpush.xpose.msra.mxu1 %v3432_v59  ;;  %733 = vmatpush.xpose.msra.mxu2 %v732_v37  ;;  %v5122_v37 = vand.u32 4294901760, %v3471_v47 }
 0x13f   : > { %5194 = vst [vmem:[#allocation12_spill] sm:$0xff] %v3474_v50  ;;  %v528_v14 = vpack.c.bf16 %v3474_v50, %v3474_v50 }
 0x140   : > { %816 = vmatpush.xpose.msra.mxu3 %v3456_v25  ;;  %v749_v9 = vsub.f32 %v3471_v47, %v5122_v37 }
 0x141   : > { %561 = vst.msk [vmem:[%s3199_s19 + $0x50] sm:$0xf] %vm540_vm1, %v528_v14  ;;  %v5125_v14 = vand.u32 4294901760, %v3488_v24 }
 0x142   : > { %666 = vmatpush.xpose.msra.mxu1 %v3447_v12  ;;  %739 = vmatpush.xpose.msra.mxu2 %v738_v20  ;;  %v598_v20 = vsel %vm593_vm2, %v3201_v11, 0  ;;  %v750_v37 = vand.u32 4294901760, %v749_v9 }
 0x143   : > { %v755_v32 = vsub.f32 %v3488_v24, %v5125_v14  ;;  %v3526_v17 = vand.u32 4294901760, %v598_v20 }
 0x144   : > { %819 = vmatpush.xpose.msra.mxu3 %v3471_v47 }
 0x145   : > { %v756_v9 = vand.u32 4294901760, %v755_v32  ;;  %v767_v32 = vsub.f32 %v3520_v30, %v5129_v8  ;;  %v3546_v27 = vsub.f32 %v598_v20, %v3526_v17 }
 0x146   : > { %v3506_v53 = vpop.f32.mrf.mxu0  ;;  %668 = vmatpush.xpose.msra.mxu1 %v3464_v35  ;;  %745 = vmatpush.xpose.msra.mxu2 %v744_v44  ;;  %v5128_v44 = vand.u32 4294901760, %v3503_v48 }
 0x147   : > { %5195 = vst [vmem:[#allocation13_spill] sm:$0xff] %v3506_v53  ;;  %v529_v57 = vpack.c.bf16 %v3506_v53, %v3506_v53  ;;  %v778_v8 = vand.u32 4294901760, %v3546_v27 }
 0x148   : > { %822 = vmatpush.xpose.msra.mxu3 %v3488_v24  ;;  %v761_v14 = vsub.f32 %v3503_v48, %v5128_v44  ;;  %v772_v44 = vand.u32 4294901760, %v3533_v1 }
 0x149   : > { %562 = vst.msk [vmem:[%s3199_s19 + $0x54] sm:$0xf] %vm540_vm1, %v529_v57 }
 0x14a   : > { %670 = vmatpush.xpose.msra.mxu1 %v3479_v2  ;;  %751 = vmatpush.xpose.msra.mxu2 %v750_v37  ;;  %v762_v57 = vand.u32 4294901760, %v761_v14  ;;  %v773_v14 = vsub.f32 %v3533_v1, %v772_v44 }
 0x14c   : > { %825 = vmatpush.xpose.msra.mxu3 %v3503_v48 }
 0x14e   : > { %v3536_v63 = vpop.f32.mrf.mxu0  ;;  %672 = vmatpush.xpose.msra.mxu1 %v3496_v5  ;;  %757 = vmatpush.xpose.msra.mxu2 %v756_v9  ;;  %v768_v9 = vand.u32 4294901760, %v767_v32  ;;  %v779_v32 = vsub.f32 %v3546_v27, %v778_v8 }
 0x14f   : > { %5196 = vst [vmem:[#allocation14_spill] sm:$0xff] %v3536_v63  ;;  %v530_v37 = vpack.c.bf16 %v3536_v63, %v3536_v63 }
 0x150   : > { %828 = vmatpush.xpose.msra.mxu3 %v3520_v30 }
 0x151   : > { %563 = vst.msk [vmem:[%s3199_s19 + $0x58] sm:$0xf] %vm540_vm1, %v530_v37 }
 0x152   : > { %674 = vmatpush.xpose.msra.mxu1 %v3511_v40  ;;  %763 = vmatpush.xpose.msra.mxu2 %v762_v57  ;;  %v774_v57 = vand.u32 4294901760, %v773_v14 }
 0x154   : > { %831 = vmatpush.xpose.msra.mxu3 %v3533_v1 }
 0x156   : > { %v3557_v20 = vpop.f32.mrf.mxu0  ;;  %676 = vmatpush.xpose.msra.mxu1 %v3526_v17  ;;  %769 = vmatpush.xpose.msra.mxu2 %v768_v9  ;;  %v780_v9 = vand.u32 4294901760, %v779_v32 }
 0x157   : > { %5197 = vst [vmem:[#allocation15_spill] sm:$0xff] %v3557_v20  ;;  %v531_v37 = vpack.c.bf16 %v3557_v20, %v3557_v20 }
 0x158   : > { %834 = vmatpush.xpose.msra.mxu3 %v3546_v27 }
 0x159   : > { %564 = vst.msk [vmem:[%s3199_s19 + $0x5c] sm:$0xf] %vm540_vm1, %v531_v37 }
 0x15a   : > { %842 = vmatpush.xpose.msrb.mxu1 %v3320_v55  ;;  %775 = vmatpush.xpose.msra.mxu2 %v774_v57  ;;  %v5202_v57 = vand.u32 4294901760, %v3360_v7  ;;  %v5204_v7 = vand.u32 4294901760, %v3375_v15 }
 0x15c   : > { %950 = vmatpush.xpose.msrb.mxu3 %v3320_v55 }
 0x15e   : > { %844 = vmatpush.xpose.msrb.mxu1 %v3308_v49  ;;  %v3576_v14 = vpop.f32.mrf.mxu0  ;;  %781 = vmatpush.xpose.msra.mxu2 %v780_v9 }
 0x15f   : > { %5198 = vst [vmem:[#allocation16_spill] sm:$0xff] %v3576_v14  ;;  %v532_v37 = vpack.c.bf16 %v3576_v14, %v3576_v14 }
 0x160   : > { %952 = vmatpush.xpose.msrb.mxu3 %v3308_v49  ;;  %v5199_v49 = vand.u32 4294901760, %v3323_v56  ;;  %v592_v56 = vld [vmem:[%s3594_s29] sm:$0x1] }
 0x161   : > { %565 = vst.msk [vmem:[%s3199_s19 + $0x60] sm:$0xf] %vm540_vm1, %v532_v37 }
 0x162   : > { %846 = vmatpush.xpose.msrb.mxu1 %v3318_v54  ;;  %883 = vmatpush.xpose.msrb.mxu2 %v688_v61 }
 0x164   : > { %954 = vmatpush.xpose.msrb.mxu3 %v3318_v54  ;;  %v5201_v54 = vand.u32 4294901760, %v3340_v62 }
 0x166   : > { %848 = vmatpush.xpose.msrb.mxu1 %v3335_v60  ;;  %887 = vmatpush.xpose.msrb.mxu2 %v5199_v49  ;;  %v3596_v55 = vpop.f32.mrf.mxu0  ;;  %v5205_v49 = vand.u32 4294901760, %v3392_v29 }
 0x167   : > { %5200 = vst [vmem:[#allocation17_spill] sm:$0xff] %v3596_v55  ;;  %v533_v58 = vpack.c.bf16 %v3596_v55, %v3596_v55 }
 0x168   : > { %956 = vmatpush.xpose.msrb.mxu3 %v3335_v60  ;;  %v595_v60 = vsel %vm593_vm2, %v592_v56, 0 }
 0x169   : > { %566 = vst.msk [vmem:[%s3199_s19 + $0x64] sm:$0xf] %vm540_vm1, %v533_v58  ;;  %v3608_v61 = vand.u32 4294901760, %v595_v60 }
 0x16a   : > { %850 = vmatpush.xpose.msrb.mxu1 %v3351_v3  ;;  %891 = vmatpush.xpose.msrb.mxu2 %v5201_v54  ;;  %v5207_v54 = vand.u32 4294901760, %v3407_v39  ;;  %v5210_v39 = vand.u32 4294901760, %v3439_v4  ;;  %v1000_v4 = vmul.f32 %v3299_v46, %v3299_v46  ;;  %v999_v46 = vmul.f32 %v3292_v43, %v3292_v43 }
 0x16b   : > { %v3614_v32 = vsub.f32 %v595_v60, %v3608_v61  ;;  %783 = vmatmul.f32.vlgmr.msra.gmra.mxu2 %v3608_v61  ;;  %v5214_v60 = vand.u32 4294901760, %v3488_v24  ;;  %v5216_v24 = vand.u32 4294901760, %v3503_v48  ;;  %v5217_v48 = vand.u32 4294901760, %v3520_v30 }
 0x16c   : > { %958 = vmatpush.xpose.msrb.mxu3 %v3351_v3  ;;  %v1045_v43 = vsel %vm593_vm2, %v999_v46, 0 }
 0x16d   : > { %v679_v3 = vand.u32 4294901760, %v3614_v32  ;;  %837 = vmatmul.f32.vlgmr.msra.gmra.mxu3 %v3614_v32 }
 0x16e   : > { %852 = vmatpush.xpose.msrb.mxu1 %v3368_v10  ;;  %895 = vmatpush.xpose.msrb.mxu2 %v5202_v57  ;;  %v3618_v62 = vpop.f32.mrf.mxu0 }
 0x16f   : > { %5203 = vst [vmem:[#allocation18_spill] sm:$0xff] %v3618_v62  ;;  %v534_v9 = vpack.c.bf16 %v3618_v62, %v3618_v62  ;;  %v680_v37 = vsub.f32 %v3614_v32, %v679_v3  ;;  %v995_v32 = vmul.f32 %v3264_v33, %v3264_v33 }
 0x170   : > { %960 = vmatpush.xpose.msrb.mxu3 %v3368_v10 }
 0x171   : > { %567 = vst.msk [vmem:[%s3199_s19 + $0x68] sm:$0xf] %vm540_vm1, %v534_v9  ;;  %v681_v10 = vand.u32 4294901760, %v680_v37  ;;  %v3710_v37 = vand.u32 4294901760, %v1045_v43  ;;  %v1033_v46 = vsel %vm593_vm2, %v995_v32, 0 }
 0x172   : > { %854 = vmatpush.xpose.msrb.mxu1 %v3383_v22  ;;  %899 = vmatpush.xpose.msrb.mxu2 %v5204_v7 }
 0x173   : > { %682 = vmatmul.f32.vlgmr.msra.gmra.mxu1 %v681_v10 }
 0x174   : > { %962 = vmatpush.xpose.msrb.mxu3 %v3383_v22  ;;  %v5208_v22 = vand.u32 4294901760, %v3424_v52  ;;  %v5211_v52 = vand.u32 4294901760, %v3456_v25 }
 0x176   : > { %856 = vmatpush.xpose.msrb.mxu1 %v3400_v34  ;;  %903 = vmatpush.xpose.msrb.mxu2 %v5205_v49  ;;  %v3637_v15 = vpop.f32.mrf.mxu0 }
 0x177   : > { %5206 = vst [vmem:[#allocation19_spill] sm:$0xff] %v3637_v15  ;;  %v535_v58 = vpack.c.bf16 %v3637_v15, %v3637_v15 }
 0x178   : > { %964 = vmatpush.xpose.msrb.mxu3 %v3400_v34 }
 0x179   : > { %568 = vst.msk [vmem:[%s3199_s19 + $0x6c] sm:$0xf] %vm540_vm1, %v535_v58 }
 0x17a   : > { %858 = vmatpush.xpose.msrb.mxu1 %v3415_v45  ;;  %907 = vmatpush.xpose.msrb.mxu2 %v5207_v54 }
 0x17c   : > { %966 = vmatpush.xpose.msrb.mxu3 %v3415_v45  ;;  %v1001_v45 = vmul.f32 %v3312_v51, %v3312_v51  ;;  %v5213_v51 = vand.u32 4294901760, %v3471_v47  ;;  %v998_v47 = vmul.f32 %v3285_v41, %v3285_v41  ;;  %v997_v41 = vmul.f32 %v3278_v38, %v3278_v38 }
 0x17d   : > { %v996_v38 = vmul.f32 %v3271_v36, %v3271_v36 }
 0x17e   : > { %860 = vmatpush.xpose.msrb.mxu1 %v3432_v59  ;;  %911 = vmatpush.xpose.msrb.mxu2 %v5208_v22  ;;  %v3651_v29 = vpop.f32.mrf.mxu0  ;;  %v1051_v56 = vsel %vm593_vm2, %v1001_v45, 0  ;;  %v1039_v58 = vsel %vm593_vm2, %v997_v41, 0  ;;  %v3733_v22 = vsub.f32 %v1045_v43, %v3710_v37 }
 0x17f   : > { %5209 = vst [vmem:[#allocation20_spill] sm:$0xff] %v3651_v29  ;;  %v536_v34 = vpack.c.bf16 %v3651_v29, %v3651_v29  ;;  %v3680_v25 = vand.u32 4294901760, %v1051_v56  ;;  %v3800_v43 = vsel %vm593_vm2, %v3651_v29, 0 }
 0x180   : > { %968 = vmatpush.xpose.msrb.mxu3 %v3432_v59 }
 0x181   : > { %569 = vst.msk [vmem:[%s3199_s19 + $0x70] sm:$0xf] %vm540_vm1, %v536_v34 }
 0x182   : > { %862 = vmatpush.xpose.msrb.mxu1 %v3447_v12  ;;  %915 = vmatpush.xpose.msrb.mxu2 %v5210_v39 }
 0x184   : > { %970 = vmatpush.xpose.msrb.mxu3 %v3447_v12 }
 0x186   : > { %864 = vmatpush.xpose.msrb.mxu1 %v3464_v35  ;;  %919 = vmatpush.xpose.msrb.mxu2 %v5211_v52  ;;  %v3667_v59 = vpop.f32.mrf.mxu0  ;;  %v3758_v52 = vand.u32 4294901760, %v1039_v58 }
 0x187   : > { %5212 = vst [vmem:[#allocation21_spill] sm:$0xff] %v3667_v59  ;;  %v537_v12 = vpack.c.bf16 %v3667_v59, %v3667_v59 }
 0x188   : > { %972 = vmatpush.xpose.msrb.mxu3 %v3464_v35  ;;  %v1048_v35 = vsel %vm593_vm2, %v1000_v4, 0 }
 0x189   : > { %570 = vst.msk [vmem:[%s3199_s19 + $0x74] sm:$0xf] %vm540_vm1, %v537_v12  ;;  %v3691_v57 = vand.u32 4294901760, %v1048_v35  ;;  %v3776_v12 = vsel %vm593_vm2, %v3667_v59, 0 }
 0x18a   : > { %866 = vmatpush.xpose.msrb.mxu1 %v3479_v2  ;;  %923 = vmatpush.xpose.msrb.mxu2 %v5213_v51  ;;  %v994_v51 = vmul.f32 %v3257_v31, %v3257_v31 }
 0x18b   : > { %v3713_v10 = vsub.f32 %v1048_v35, %v3691_v57  ;;  %v3785_v35 = vsub.f32 %v1039_v58, %v3758_v52  ;;  %v3823_v58 = vsel %vm593_vm2, %v3637_v15, 0 }
 0x18c   : > { %974 = vmatpush.xpose.msrb.mxu3 %v3479_v2  ;;  %v3694_v2 = vsub.f32 %v1051_v56, %v3680_v25  ;;  %v5132_v56 = vand.u32 4294901760, %v3733_v22 }
 0x18d   : > { %v5134_v36 = vand.u32 4294901760, %v3713_v10 }
 0x18e   : > { %868 = vmatpush.xpose.msrb.mxu1 %v3496_v5  ;;  %927 = vmatpush.xpose.msrb.mxu2 %v5214_v60  ;;  %v3696_v9 = vpop.f32.mrf.mxu0  ;;  %v5135_v49 = vand.u32 4294901760, %v3694_v2  ;;  %v1109_v27 = vsub.f32 %v3733_v22, %v5132_v56 }
 0x18f   : > { %5215 = vst [vmem:[#allocation22_spill] sm:$0xff] %v3696_v9  ;;  %v538_v7 = vpack.c.bf16 %v3696_v9, %v3696_v9  ;;  %v1103_v33 = vsub.f32 %v3713_v10, %v5134_v36 }
 0x190   : > { %976 = vmatpush.xpose.msrb.mxu3 %v3496_v5  ;;  %v1042_v5 = vsel %vm593_vm2, %v998_v47, 0  ;;  %v1097_v30 = vsub.f32 %v3694_v2, %v5135_v49  ;;  %v3790_v47 = vand.u32 4294901760, %v3776_v12 }
 0x191   : > { %571 = vst.msk [vmem:[%s3199_s19 + $0x78] sm:$0xf] %vm540_vm1, %v538_v7  ;;  %v993_v7 = vmul.f32 %v3250_v28, %v3250_v28  ;;  %v5130_v28 = vand.u32 4294901760, %v3785_v35 }
 0x192   : > { %870 = vmatpush.xpose.msrb.mxu1 %v3511_v40  ;;  %931 = vmatpush.xpose.msrb.mxu2 %v5216_v24  ;;  %v1098_v1 = vand.u32 4294901760, %v1097_v30  ;;  %v1030_v24 = vsel %vm593_vm2, %v994_v51, 0  ;;  %v992_v30 = vmul.f32 %v3243_v26, %v3243_v26 }
 0x193   : > { %v1121_v51 = vsub.f32 %v3785_v35, %v5130_v28 }
 0x194   : > { %978 = vmatpush.xpose.msrb.mxu3 %v3511_v40  ;;  %v3722_v40 = vand.u32 4294901760, %v1042_v5 }
 0x195   : > { %v1122_v28 = vand.u32 4294901760, %v1121_v51 }
 0x196   : > { %872 = vmatpush.xpose.msrb.mxu1 %v3526_v17  ;;  %935 = vmatpush.xpose.msrb.mxu2 %v5217_v48  ;;  %v3726_v54 = vpop.f32.mrf.mxu0  ;;  %v3763_v4 = vsub.f32 %v1042_v5, %v3722_v40  ;;  %v3810_v5 = vand.u32 4294901760, %v1033_v46  ;;  %v3813_v48 = vand.u32 4294901760, %v3800_v43 }
 0x197   : > { %5218 = vst [vmem:[#allocation23_spill] sm:$0xff] %v3726_v54  ;;  %v539_v34 = vpack.c.bf16 %v3726_v54, %v3726_v54  ;;  %v3746_v39 = vsel %vm593_vm2, %v3726_v54, 0 }
 0x198   : > { %980 = vmatpush.xpose.msrb.mxu3 %v3526_v17  ;;  %v3740_v17 = vsel %vm593_vm2, %v3696_v9, 0  ;;  %v3751_v45 = vand.u32 4294901760, %v3746_v39  ;;  %v5131_v31 = vand.u32 4294901760, %v3763_v4  ;;  %v3830_v32 = vsub.f32 %v1033_v46, %v3810_v5 }
 0x199   : > { %876 = vmatmul.f32.vlgmr.msrb.gmra.mxu1 %v679_v3  ;;  %v1036_v3 = vsel %vm593_vm2, %v996_v38, 0  ;;  %572 = vst.msk [vmem:[%s3199_s19 + $0x7c] sm:$0xf] %vm540_vm1, %v539_v34  ;;  %v1027_v34 = vsel %vm593_vm2, %v993_v7, 0  ;;  %v3845_v46 = vsel %vm593_vm2, %v3618_v62, 0  ;;  %s2716_s19 = sshll.u32 %s2713_s17, 4  ;;  %s2717_s19 = int_to_ptr.hbm [resolvable:$true] %s2716_s19 }
 0x19a   : > { %1054 = vmatpush.xpose.msra.mxu1 %v3680_v25  ;;  %939 = vmatpush.xpose.msrb.mxu2 %v772_v44  ;;  %v3766_v44 = vand.u32 4294901760, %v3740_v17  ;;  %v3787_v60 = vand.u32 4294901760, %v1036_v3  ;;  %v1115_v38 = vsub.f32 %v3763_v4, %v5131_v31  ;;  %s3028_s20 = sshra.s32 %s2717_s19, 4  ;;  %s3029_s20 = int_to_ptr.hbm [resolvable:$true] %s3028_s20 }
 0x19b   : > { %982 = vmatmul.f32.vlgmr.msrb.gmra.mxu3 %v3608_v61  ;;  %1708 = vmatpush.xpose.msrb.mxu0 %v3751_v45  ;;  %s3030_s21 = scalar_lea.hbm %s3029_s20, 16  ;;  %p3035_p1 = scmp.lt.s32.totalorder %s3029_s20, %s5115_s4 }
 0x19c   : > { %1197 = vmatpush.xpose.msra.mxu3 %v3694_v2  ;;  %v3808_v41 = vsub.f32 %v1036_v3, %v3787_v60  ;;  %v3832_v3 = vand.u32 4294901760, %v1030_v24  ;;  %p3031_p12 = scmp.ne.s32.totalorder %s3029_s20, %s3030_s21 }
 0x19e   : > { %1056 = vmatpush.xpose.msra.mxu1 %v3691_v57  ;;  %943 = vmatpush.xpose.msrb.mxu2 %v778_v8  ;;  %v1104_v8 = vand.u32 4294901760, %v1103_v33  ;;  %v1116_v33 = vand.u32 4294901760, %v1115_v38  ;;  %v5133_v26 = vand.u32 4294901760, %v3808_v41  ;;  %v3852_v7 = vsub.f32 %v1030_v24, %v3832_v3  ;;  %p3032_p13 = pnand %p3031_p12, %p3157_p5 }
 0x19f   : > { %1710 = vmatpush.xpose.msrb.mxu0 %v3766_v44  ;;  %v3857_v38 = vand.u32 4294901760, %v3845_v46  ;;  %v3867_v24 = vsel %vm593_vm2, %v3596_v55, 0 }
 0x1a0   : > { %1200 = vmatpush.xpose.msra.mxu3 %v3713_v10  ;;  %p3033_p0 = pneg %p3032_p13 }
 0x1a1   : > { %945 = vmatmul.f32.vlgmr.msrb.gmra.mxu2 %v3608_v61  ;;  %v1110_v61 = vand.u32 4294901760, %v1109_v27  ;;  %v1024_v27 = vsel %vm593_vm2, %v992_v30, 0  ;;  %v990_v30 = vmul.f32 %v3229_v21, %v3229_v21 }
 0x1a2   : > { %1058 = vmatpush.xpose.msra.mxu1 %v3710_v37  ;;  %1099 = vmatpush.xpose.msra.mxu2 %v1098_v1  ;;  %v3835_v1 = vand.u32 4294901760, %v3823_v58  ;;  %v3873_v56 = vand.u32 4294901760, %v1024_v27 }
 0x1a3   : > { %1712 = vmatpush.xpose.msrb.mxu0 %v3790_v47  ;;  %v1018_v49 = vsel %vm593_vm2, %v990_v30, 0  ;;  %v988_v30 = vmul.f32 %v3215_v16, %v3215_v16 }
 0x1a4   : > { %1203 = vmatpush.xpose.msra.mxu3 %v3733_v22  ;;  %v3917_v15 = vand.u32 4294901760, %v1018_v49 }
 0x1a5   : > { %v1012_v29 = vsel %vm593_vm2, %v988_v30, 0  ;;  %v986_v30 = vmul.f32 %v3201_v11, %v3201_v11 }
 0x1a6   : > { %1060 = vmatpush.xpose.msra.mxu1 %v3722_v40  ;;  %1105 = vmatpush.xpose.msra.mxu2 %v1104_v8  ;;  %v991_v8 = vmul.f32 %v3236_v23, %v3236_v23  ;;  %v5137_v23 = vand.u32 4294901760, %v3830_v32  ;;  %v3961_v54 = vand.u32 4294901760, %v1012_v29 }
 0x1a7   : > { %1714 = vmatpush.xpose.msrb.mxu0 %v3813_v48 }
 0x1a8   : > { %1206 = vmatpush.xpose.msra.mxu3 %v3763_v4  ;;  %v1021_v31 = vsel %vm593_vm2, %v991_v8, 0  ;;  %v3889_v8 = vsel %vm593_vm2, %v3576_v14, 0 }
 0x1a9   : > { %v3898_v55 = vand.u32 4294901760, %v1021_v31 }
 0x1aa   : > { %1062 = vmatpush.xpose.msra.mxu1 %v3758_v52  ;;  %1111 = vmatpush.xpose.msra.mxu2 %v1110_v61  ;;  %v3854_v61 = vand.u32 4294901760, %v1027_v34 }
 0x1ab   : > { %1716 = vmatpush.xpose.msrb.mxu0 %v3835_v1 }
 0x1ac   : > { %1209 = vmatpush.xpose.msra.mxu3 %v3785_v35  ;;  %v3876_v51 = vsub.f32 %v1027_v34, %v3854_v61  ;;  %v989_v34 = vmul.f32 %v3222_v18, %v3222_v18 }
 0x1ae   : > { %1064 = vmatpush.xpose.msra.mxu1 %v3787_v60  ;;  %1117 = vmatpush.xpose.msra.mxu2 %v1116_v33  ;;  %v1127_v33 = vsub.f32 %v3808_v41, %v5133_v26  ;;  %5219 = vst [vmem:[#allocation24_spill] sm:$0xff] %v3876_v51  ;;  %v3879_v26 = vand.u32 4294901760, %v3867_v24  ;;  %v1015_v62 = vsel %vm593_vm2, %v989_v34, 0  ;;  %v3933_v34 = vsel %vm593_vm2, %v3536_v63, 0 }
 0x1af   : > { %1718 = vmatpush.xpose.msrb.mxu0 %v3857_v38  ;;  %v3942_v59 = vand.u32 4294901760, %v1015_v62 }
 0x1b0   : > { %1212 = vmatpush.xpose.msra.mxu3 %v3808_v41  ;;  %v1128_v36 = vand.u32 4294901760, %v1127_v33  ;;  %v3896_v33 = vsub.f32 %v1024_v27, %v3873_v56  ;;  %v3911_v27 = vsel %vm593_vm2, %v3557_v20, 0 }
 0x1b1   : > { %5225 = vst [vmem:[#allocation28_spill] sm:$0xff] %v3942_v59 }
 0x1b2   : > { %1066 = vmatpush.xpose.msra.mxu1 %v3810_v5  ;;  %1123 = vmatpush.xpose.msra.mxu2 %v1122_v28  ;;  %v1133_v28 = vsub.f32 %v3830_v32, %v5137_v23  ;;  %5220 = vst [vmem:[#allocation25_spill] sm:$0xff] %v3896_v33  ;;  %v3901_v23 = vand.u32 4294901760, %v3889_v8 }
 0x1b3   : > { %1720 = vmatpush.xpose.msrb.mxu0 %v3879_v26 }
 0x1b4   : > { %1215 = vmatpush.xpose.msra.mxu3 %v3830_v32  ;;  %v1134_v21 = vand.u32 4294901760, %v1133_v28  ;;  %v3920_v28 = vsub.f32 %v1021_v31, %v3898_v55  ;;  %v987_v31 = vmul.f32 %v3208_v13, %v3208_v13 }
 0x1b6   : > { %1068 = vmatpush.xpose.msra.mxu1 %v3832_v3  ;;  %1129 = vmatpush.xpose.msra.mxu2 %v1128_v36  ;;  %v5221_v36 = vand.u32 4294901760, %v3852_v7  ;;  %5222 = vst [vmem:[#allocation26_spill] sm:$0xff] %v3920_v28  ;;  %v1009_v9 = vsel %vm593_vm2, %v987_v31, 0  ;;  %v3977_v31 = vsel %vm593_vm2, %v3474_v50, 0 }
 0x1b7   : > { %1722 = vmatpush.xpose.msrb.mxu0 %v3901_v23 }
 0x1b8   : > { %1218 = vmatpush.xpose.msra.mxu3 %v3852_v7  ;;  %v1139_v14 = vsub.f32 %v3852_v7, %v5221_v36  ;;  %v3923_v36 = vand.u32 4294901760, %v3911_v27 }
 0x1ba   : > { %1070 = vmatpush.xpose.msra.mxu1 %v3854_v61  ;;  %1135 = vmatpush.xpose.msra.mxu2 %v1134_v21  ;;  %v1140_v18 = vand.u32 4294901760, %v1139_v14  ;;  %v5223_v21 = vand.u32 4294901760, %v3876_v51  ;;  %v3940_v14 = vsub.f32 %v1018_v49, %v3917_v15  ;;  %v3955_v49 = vsel %vm593_vm2, %v3506_v53, 0 }
 0x1bb   : > { %1724 = vmatpush.xpose.msrb.mxu0 %v3923_v36 }
 0x1bc   : > { %1221 = vmatpush.xpose.msra.mxu3 %v3876_v51  ;;  %v1145_v20 = vsub.f32 %v3876_v51, %v5223_v21  ;;  %5224 = vst [vmem:[#allocation27_spill] sm:$0xff] %v3940_v14  ;;  %v3945_v21 = vand.u32 4294901760, %v3933_v34  ;;  %v5152_v11 = vand.u32 4294901760, %v3940_v14  ;;  %v3984_v51 = vand.u32 4294901760, %v1009_v9 }
 0x1be   : > { %1072 = vmatpush.xpose.msra.mxu1 %v3873_v56  ;;  %1141 = vmatpush.xpose.msra.mxu2 %v1140_v18  ;;  %v1146_v16 = vand.u32 4294901760, %v1145_v20  ;;  %v5226_v18 = vand.u32 4294901760, %v3896_v33  ;;  %v3964_v20 = vsub.f32 %v1015_v62, %v3942_v59  ;;  %v1006_v62 = vsel %vm593_vm2, %v986_v30, 0 }
 0x1bf   : > { %1726 = vmatpush.xpose.msrb.mxu0 %v3945_v21  ;;  %v1163_v50 = vsub.f32 %v3940_v14, %v5152_v11  ;;  %v4000_v30 = vand.u32 4294901760, %v1006_v62 }
 0x1c0   : > { %1224 = vmatpush.xpose.msra.mxu3 %v3896_v33  ;;  %v1151_v63 = vsub.f32 %v3896_v33, %v5226_v18  ;;  %v3967_v18 = vand.u32 4294901760, %v3955_v49  ;;  %v3982_v33 = vsub.f32 %v1012_v29, %v3961_v54  ;;  %v3997_v29 = vsel %vm593_vm2, %v3442_v6, 0 }
 0x1c1   : > { %v1164_v11 = vand.u32 4294901760, %v1163_v50 }
 0x1c2   : > { %1074 = vmatpush.xpose.msra.mxu1 %v3898_v55  ;;  %1147 = vmatpush.xpose.msra.mxu2 %v1146_v16  ;;  %v1152_v13 = vand.u32 4294901760, %v1151_v63  ;;  %v5227_v16 = vand.u32 4294901760, %v3920_v28  ;;  %5228 = vst [vmem:[#allocation29_spill] sm:$0xff] %v3982_v33  ;;  %v3987_v63 = vand.u32 4294901760, %v3977_v31 }
 0x1c3   : > { %1728 = vmatpush.xpose.msrb.mxu0 %v3967_v18 }
 0x1c4   : > { %1227 = vmatpush.xpose.msra.mxu3 %v3920_v28  ;;  %v1157_v53 = vsub.f32 %v3920_v28, %v5227_v16  ;;  %v4003_v28 = vsub.f32 %v1009_v9, %v3984_v51  ;;  %v4020_v9 = vsub.f32 %v1006_v62, %v4000_v30 }
 0x1c6   : > { %1076 = vmatpush.xpose.msra.mxu1 %v3917_v15  ;;  %1153 = vmatpush.xpose.msra.mxu2 %v1152_v13  ;;  %v1158_v16 = vand.u32 4294901760, %v1157_v53  ;;  %v5157_v13 = vand.u32 4294901760, %v3964_v20  ;;  %5229 = vst [vmem:[#allocation30_spill] sm:$0xff] %v4003_v28  ;;  %v4006_v53 = vand.u32 4294901760, %v3997_v29 }
 0x1c7   : > { %1730 = vmatpush.xpose.msrb.mxu0 %v3987_v63 }
 0x1c8   : > { %1230 = vmatpush.xpose.msra.mxu3 %v3940_v14  ;;  %v1169_v6 = vsub.f32 %v3964_v20, %v5157_v13  ;;  %v5159_v14 = vand.u32 4294901760, %v3982_v33 }
 0x1ca   : > { %1078 = vmatpush.xpose.msra.mxu1 %v3942_v59  ;;  %1159 = vmatpush.xpose.msra.mxu2 %v1158_v16  ;;  %v4016_v16 = vsel %vm593_vm2, %v3410_v42, 0  ;;  %v1170_v50 = vand.u32 4294901760, %v1169_v6  ;;  %v1175_v13 = vsub.f32 %v3982_v33, %v5159_v14  ;;  %v5162_v42 = vand.u32 4294901760, %v4003_v28 }
 0x1cb   : > { %v4023_v59 = vand.u32 4294901760, %v4016_v16  ;;  %1732 = vmatpush.xpose.msrb.mxu0 %v4006_v53 }
 0x1cc   : > { %1233 = vmatpush.xpose.msra.mxu3 %v3964_v20  ;;  %v1176_v6 = vand.u32 4294901760, %v1175_v13  ;;  %v1181_v14 = vsub.f32 %v4003_v28, %v5162_v42 }
 0x1ce   : > { %1080 = vmatpush.xpose.msra.mxu1 %v3961_v54  ;;  %1165 = vmatpush.xpose.msra.mxu2 %v1164_v11  ;;  %v4033_v11 = vsel %vm593_vm2, %v3378_v19, 0  ;;  %v4047_v19 = vsel %vm593_vm2, %v3343_v0, 0  ;;  %v1182_v42 = vand.u32 4294901760, %v1181_v14  ;;  %v4073_v14 = vsub.f32 %v3776_v12, %v3790_v47 }
 0x1cf   : > { %v4037_v62 = vand.u32 4294901760, %v4033_v11  ;;  %1734 = vmatpush.xpose.msrb.mxu0 %v4023_v59  ;;  %v4056_v13 = vand.u32 4294901760, %v4047_v19  ;;  %v5232_v12 = vand.u32 4294901760, %v3733_v22  ;;  %v5165_v22 = vmov 0  }
 0x1d0   : > { %1236 = vmatpush.xpose.msra.mxu3 %v3982_v33  ;;  %v1186_v33 = vand.u32 4294901760, %v4020_v9  ;;  %2996 = vset.pattern.permute.xlu1 %v5165_v22 }
 0x1d1   : > { %2997 = vset.pattern.permute.xlu2 %v5165_v22 }
 0x1d2   : > { %1082 = vmatpush.xpose.msra.mxu1 %v3984_v51  ;;  %1171 = vmatpush.xpose.msra.mxu2 %v1170_v50  ;;  %v4051_v50 = vsub.f32 %v3746_v39, %v3751_v45  ;;  %v1187_v0 = vsub.f32 %v4020_v9, %v1186_v33  ;;  %v4065_v39 = vsub.f32 %v3740_v17, %v3766_v44 }
 0x1d3   : > { %1736 = vmatpush.xpose.msrb.mxu0 %v4037_v62 }
 0x1d4   : > { %1239 = vmatpush.xpose.msra.mxu3 %v4003_v28  ;;  %v1188_v28 = vand.u32 4294901760, %v1187_v0  ;;  %v1756_v17 = vand.u32 4294901760, %v4065_v39  ;;  %v4084_v0 = vsub.f32 %v3800_v43, %v3813_v48  ;;  %v2920_v43 = vld [vmem:[%s3594_s29 + $0x1] sm:$0x1]  ;;  %s3034_s29 = scalar_lea.hbm %s5115_s4, 32 }
 0x1d5   : > { %p3036_p2 = scmp.lt.s32.totalorder %s3034_s29, %s3030_s21 }
 0x1d6   : > { %1084 = vmatpush.xpose.msra.mxu1 %v4000_v30  ;;  %1177 = vmatpush.xpose.msra.mxu2 %v1176_v6  ;;  %v1750_v6 = vand.u32 4294901760, %v4051_v50 }
 0x1d7   : > { %1738 = vmatpush.xpose.msrb.mxu0 %v4056_v13  ;;  %p3037_p3 = por %p3036_p2, %p3035_p1 }
 0x1d8   : > { %1242 = vmatpush.xpose.msra.mxu3 %v4020_v9 }
 0x1d9   : > { %p3038_p4 = pnand %p3037_p3, %p3033_p0 }
 0x1da   : > { %1250 = vmatpush.xpose.msrb.mxu1 %v3680_v25  ;;  %1183 = vmatpush.xpose.msra.mxu2 %v1182_v42  ;;  %v5230_v42 = vand.u32 4294901760, %v3694_v2  ;;  %v4095_v2 = vsub.f32 %v3823_v58, %v3835_v1  ;;  %v1657_v58 = vsel %vm593_vm2, %v2920_v43, 0  ;;  %v5235_v43 = vand.u32 4294901760, %v3785_v35 }
 0x1db   : > { %1945 = vmatpush.xpose.msra.mxu0 %v1750_v6  ;;  %v5236_v35 = vand.u32 4294901760, %v3808_v41 }
 0x1dc   : > { %1358 = vmatpush.xpose.msrb.mxu3 %v3680_v25  ;;  %v1762_v25 = vand.u32 4294901760, %v4073_v14 }
 0x1de   : > { %1252 = vmatpush.xpose.msrb.mxu1 %v3691_v57  ;;  %1189 = vmatpush.xpose.msra.mxu2 %v1188_v28  ;;  %v5233_v28 = vand.u32 4294901760, %v3763_v4 }
 0x1df   : > { %1949 = vmatpush.xpose.msra.mxu0 %v1756_v17 }
 0x1e0   : > { %1360 = vmatpush.xpose.msrb.mxu3 %v3691_v57  ;;  %v5231_v57 = vand.u32 4294901760, %v3713_v10  ;;  %v4107_v10 = vsub.f32 %v3845_v46, %v3857_v38 }
 0x1e2   : > { %1254 = vmatpush.xpose.msrb.mxu1 %v3710_v37  ;;  %1291 = vmatpush.xpose.msrb.mxu2 %v5230_v42  ;;  %v1003_v42 = vsel %vm593_vm2, 1.0, %v5165_v22  ;;  %v1780_v4 = vand.u32 4294901760, %v4107_v10 }
 0x1e3   : > { %1953 = vmatpush.xpose.msra.mxu0 %v1762_v25  ;;  %v4119_v46 = vsub.f32 %v1003_v42, %v1003_v42 }
 0x1e4   : > { %1362 = vmatpush.xpose.msrb.mxu3 %v3710_v37  ;;  %v1768_v37 = vand.u32 4294901760, %v4084_v0 }
 0x1e5   : > { %1245 = vmatmul.f32.vlgmr.msra.gmra.mxu3 %v4119_v46 }
 0x1e6   : > { %1256 = vmatpush.xpose.msrb.mxu1 %v3722_v40  ;;  %1295 = vmatpush.xpose.msrb.mxu2 %v5231_v57  ;;  %v4131_v57 = vand.u32 4294901760, %v1657_v58 }
 0x1e7   : > { %1957 = vmatpush.xpose.msra.mxu0 %v1768_v37 }
 0x1e8   : > { %1364 = vmatpush.xpose.msrb.mxu3 %v3722_v40  ;;  %v1774_v40 = vand.u32 4294901760, %v4095_v2  ;;  %v4153_v22 = vsub.f32 %v1657_v58, %v4131_v57 }
 0x1ea   : > { %1258 = vmatpush.xpose.msrb.mxu1 %v3758_v52  ;;  %1299 = vmatpush.xpose.msrb.mxu2 %v5232_v12  ;;  %v4134_v12 = vand.u32 4294901760, %v4119_v46 }
 0x1eb   : > { %1961 = vmatpush.xpose.msra.mxu0 %v1774_v40 }
 0x1ec   : > { %1366 = vmatpush.xpose.msrb.mxu3 %v3758_v52  ;;  %v4125_v52 = vsub.f32 %v3867_v24, %v3879_v26  ;;  %5234 = vst [vmem:[#allocation31_spill] sm:$0xff] %v4134_v12  ;;  %v4144_v24 = vsub.f32 %v3889_v8, %v3901_v23  ;;  %v5171_v8 = vmov 1.0  }
 0x1ed   : > { %2915 = vmatmul.msk.f32.vlgmr.msra.gmra.mxu2 %vm593_vm2, %v5171_v8 }
 0x1ee   : > { %1260 = vmatpush.xpose.msrb.mxu1 %v3787_v60  ;;  %1303 = vmatpush.xpose.msrb.mxu2 %v5233_v28  ;;  %v1786_v28 = vand.u32 4294901760, %v4125_v52  ;;  %v1792_v41 = vand.u32 4294901760, %v4144_v24 }
 0x1ef   : > { %1965 = vmatpush.xpose.msra.mxu0 %v1780_v4 }
 0x1f0   : > { %1368 = vmatpush.xpose.msrb.mxu3 %v3787_v60  ;;  %v1088_v60 = vsub.f32 %v4119_v46, %v4134_v12 }
 0x1f2   : > { %1262 = vmatpush.xpose.msrb.mxu1 %v3810_v5  ;;  %1307 = vmatpush.xpose.msrb.mxu2 %v5235_v43  ;;  %v4150_v42 = vand.u32 4294901760, %v1088_v60  ;;  %v4164_v43 = vsub.f32 %v3911_v27, %v3923_v36  ;;  %v5237_v60 = vand.u32 4294901760, %v3830_v32  ;;  %v4178_v27 = vsub.f32 %v3933_v34, %v3945_v21  ;;  %v5239_v34 = vld [vmem:[#allocation24_spill] sm:$0xff] }
 0x1f3   : > { %1969 = vmatpush.xpose.msra.mxu0 %v1786_v28  ;;  %v4189_v32 = vsub.f32 %v3955_v49, %v3967_v18  ;;  %v5241_v49 = vld [vmem:[#allocation25_spill] sm:$0xff] }
 0x1f4   : > { %1370 = vmatpush.xpose.msrb.mxu3 %v3810_v5  ;;  %1090 = vmatmul.f32.vlgmr.msra.gmra.mxu1 %v4150_v42  ;;  %v5167_v5 = vand.u32 4294901760, %v4153_v22 }
 0x1f6   : > { %1264 = vmatpush.xpose.msrb.mxu1 %v3832_v3  ;;  %1311 = vmatpush.xpose.msrb.mxu2 %v5236_v35  ;;  %v1742_v58 = vsub.f32 %v4153_v22, %v5167_v5  ;;  %v5238_v5 = vand.u32 4294901760, %v3852_v7  ;;  %v4200_v7 = vsub.f32 %v3977_v31, %v3987_v63 }
 0x1f7   : > { %1973 = vmatpush.xpose.msra.mxu0 %v1792_v41 }
 0x1f8   : > { %1372 = vmatpush.xpose.msrb.mxu3 %v3832_v3  ;;  %v1743_v35 = vand.u32 4294901760, %v1742_v58  ;;  %v1798_v3 = vand.u32 4294901760, %v4164_v43  ;;  %v5240_v58 = vand.u32 4294901760, %v5239_v34  ;;  %v5170_v31 = vand.u32 4294901760, %v4200_v7 }
 0x1fa   : > { %1266 = vmatpush.xpose.msrb.mxu1 %v3854_v61  ;;  %1315 = vmatpush.xpose.msrb.mxu2 %v5237_v60  ;;  %v5243_v60 = vld [vmem:[#allocation28_spill] sm:$0xff] }
 0x1fb   : > { %1744 = vmatmul.f32.vlgmr.msrb.gmra.mxu0 %v1743_v35  ;;  %v5244_v35 = vld [vmem:[#allocation26_spill] sm:$0xff] }
 0x1fc   : > { %1374 = vmatpush.xpose.msrb.mxu3 %v3854_v61  ;;  %1977 = vmatpush.xpose.msra.mxu0 %v1798_v3  ;;  %v1804_v61 = vand.u32 4294901760, %v4178_v27  ;;  %v5245_v34 = vand.u32 4294901760, %v5244_v35 }
 0x1fe   : > { %1268 = vmatpush.xpose.msrb.mxu1 %v3873_v56  ;;  %1319 = vmatpush.xpose.msrb.mxu2 %v5238_v5  ;;  %v5242_v5 = vand.u32 4294901760, %v5241_v49 }
 0x200   : > { %1376 = vmatpush.xpose.msrb.mxu3 %v3873_v56  ;;  %1981 = vmatpush.xpose.msra.mxu0 %v1804_v61  ;;  %v1810_v56 = vand.u32 4294901760, %v4189_v32 }
 0x202   : > { %1270 = vmatpush.xpose.msrb.mxu1 %v3898_v55  ;;  %1323 = vmatpush.xpose.msrb.mxu2 %v5240_v58  ;;  %v5246_v58 = vld [vmem:[#allocation23_spill] sm:$0xff] }
 0x203   : > { %v2063_v49 = vmul.f32 %v5246_v58, %v5246_v58  ;;  %v5249_v58 = vand.u32 4294901760, %v3964_v20  ;;  %v4260_v20 = vsub.f32 %v4047_v19, %v4056_v13 }
 0x204   : > { %1378 = vmatpush.xpose.msrb.mxu3 %v3898_v55  ;;  %1985 = vmatpush.xpose.msra.mxu0 %v1810_v56  ;;  %v4215_v55 = vsub.f32 %v3997_v29, %v4006_v53  ;;  %v5247_v29 = vld [vmem:[#allocation27_spill] sm:$0xff] }
 0x206   : > { %1272 = vmatpush.xpose.msrb.mxu1 %v3917_v15  ;;  %1327 = vmatpush.xpose.msrb.mxu2 %v5242_v5  ;;  %v5248_v5 = vand.u32 4294901760, %v5247_v29  ;;  %v5168_v35 = vand.u32 4294901760, %v4215_v55 }
 0x208   : > { %1380 = vmatpush.xpose.msrb.mxu3 %v3917_v15  ;;  %1989 = vmatpush.xpose.msra.mxu0 %v5170_v31  ;;  %v4225_v15 = vsub.f32 %v4016_v16, %v4023_v59  ;;  %v4241_v16 = vsub.f32 %v4033_v11, %v4037_v62 }
 0x20a   : > { %1274 = vmatpush.xpose.msrb.mxu1 %v5243_v60  ;;  %1331 = vmatpush.xpose.msrb.mxu2 %v5245_v34  ;;  %v2110_v34 = vsel %vm593_vm2, %v2063_v49, 0  ;;  %v5169_v29 = vand.u32 4294901760, %v4225_v15  ;;  %v5251_v49 = vld [vmem:[#allocation29_spill] sm:$0xff] }
 0x20b   : > { %v4256_v11 = vand.u32 4294901760, %v2110_v34 }
 0x20c   : > { %1382 = vmatpush.xpose.msrb.mxu3 %v5243_v60  ;;  %v1751_v60 = vsub.f32 %v4051_v50, %v1750_v6  ;;  %1993 = vmatpush.xpose.msra.mxu0 %v5168_v35  ;;  %v1757_v35 = vsub.f32 %v4065_v39, %v1756_v17 }
 0x20d   : > { %v4276_v19 = vsub.f32 %v2110_v34, %v4256_v11  ;;  %v1769_v34 = vsub.f32 %v4084_v0, %v1768_v37 }
 0x20e   : > { %1276 = vmatpush.xpose.msrb.mxu1 %v3961_v54  ;;  %1335 = vmatpush.xpose.msrb.mxu2 %v5248_v5  ;;  %v5250_v5 = vld [vmem:[#allocation22_spill] sm:$0xff] }
 0x20f   : > { %v2062_v6 = vmul.f32 %v5250_v5, %v5250_v5  ;;  %v5253_v5 = vld [vmem:[#allocation21_spill] sm:$0xff] }
 0x210   : > { %1384 = vmatpush.xpose.msrb.mxu3 %v3961_v54  ;;  %v1752_v54 = vand.u32 4294901760, %v1751_v60  ;;  %1997 = vmatpush.xpose.msra.mxu0 %v5169_v29  ;;  %v1834_v60 = vand.u32 4294901760, %v4241_v16  ;;  %v2061_v17 = vmul.f32 %v5253_v5, %v5253_v5  ;;  %v1763_v29 = vsub.f32 %v4073_v14, %v1762_v25 }
 0x211   : > { %v2107_v31 = vsel %vm593_vm2, %v2062_v6, 0  ;;  %v5256_v6 = vld [vmem:[#allocation20_spill] sm:$0xff] }
 0x212   : > { %1278 = vmatpush.xpose.msrb.mxu1 %v3984_v51  ;;  %1339 = vmatpush.xpose.msrb.mxu2 %v5249_v58  ;;  %v5252_v58 = vand.u32 4294901760, %v5251_v49  ;;  %v1840_v49 = vand.u32 4294901760, %v4260_v20  ;;  %v4283_v25 = vand.u32 4294901760, %v2107_v31  ;;  %v2104_v5 = vsel %vm593_vm2, %v2061_v17, 0 }
 0x213   : > { %v1770_v17 = vand.u32 4294901760, %v1769_v34 }
 0x214   : > { %1386 = vmatpush.xpose.msrb.mxu3 %v3984_v51  ;;  %v1758_v51 = vand.u32 4294901760, %v1757_v35  ;;  %2001 = vmatpush.xpose.msra.mxu0 %v1834_v60 }
 0x216   : > { %1280 = vmatpush.xpose.msrb.mxu1 %v4000_v30  ;;  %1343 = vmatpush.xpose.msrb.mxu2 %v5252_v58  ;;  %v1764_v58 = vand.u32 4294901760, %v1763_v29  ;;  %v4300_v29 = vsub.f32 %v2107_v31, %v4283_v25 }
 0x218   : > { %1388 = vmatpush.xpose.msrb.mxu3 %v4000_v30  ;;  %v2060_v30 = vmul.f32 %v5256_v6, %v5256_v6  ;;  %2005 = vmatpush.xpose.msra.mxu0 %v1840_v49 }
 0x219   : > { %1284 = vmatmul.f32.vlgmr.msrb.gmra.mxu1 %v4134_v12 }
 0x21a   : > { %1753 = vmatpush.xpose.msra.mxu1 %v1752_v54  ;;  %v5254_v54 = vld [vmem:[#allocation30_spill] sm:$0xff]  ;;  %v2101_v6 = vsel %vm593_vm2, %v2060_v30, 0  ;;  %v1781_v30 = vsub.f32 %v4107_v10, %v1780_v4  ;;  %v1787_v4 = vsub.f32 %v4125_v52, %v1786_v28 }
 0x21b   : > { %v5255_v35 = vand.u32 4294901760, %v5254_v54  ;;  %2917 = vmatmul.msk.f32.vlgmr.msrb.gmra.mxu3 %vm593_vm2, %v5171_v8  ;;  %v5257_v54 = vld [vmem:[#allocation19_spill] sm:$0xff]  ;;  %2007 = vmatmul.f32.vlgmr.msra.gmra.mxu0 %v4131_v57  ;;  %v4319_v9 = vand.u32 4294901760, %v2101_v6 }
 0x21c   : > { %1904 = vmatpush.xpose.msra.mxu3 %v3751_v45  ;;  %2256 = vmatpush.xpose.msrb.mxu0 %v4276_v19  ;;  %v2059_v37 = vmul.f32 %v5257_v54, %v5257_v54  ;;  %v5259_v54 = vld [vmem:[#allocation17_spill] sm:$0xff] }
 0x21d   : > { %1347 = vmatpush.xpose.msrb.mxu2 %v5255_v35  ;;  %v1775_v35 = vsub.f32 %v4095_v2, %v1774_v40  ;;  %v4331_v34 = vsub.f32 %v2101_v6, %v4319_v9 }
 0x21e   : > { %1759 = vmatpush.xpose.msra.mxu1 %v1758_v51  ;;  %v4302_v51 = vand.u32 4294901760, %v2104_v5 }
 0x21f   : > { %v1776_v40 = vand.u32 4294901760, %v1775_v35 }
 0x220   : > { %1906 = vmatpush.xpose.msra.mxu3 %v3766_v44  ;;  %2259 = vmatpush.xpose.msrb.mxu0 %v4300_v29 }
 0x221   : > { %1351 = vmatpush.xpose.msrb.mxu2 %v1186_v33  ;;  %v4317_v33 = vsub.f32 %v2104_v5, %v4302_v51 }
 0x222   : > { %1765 = vmatpush.xpose.msra.mxu1 %v1764_v58  ;;  %v2098_v58 = vsel %vm593_vm2, %v2059_v37, 0 }
 0x223   : > { %v4333_v5 = vand.u32 4294901760, %v2098_v58 }
 0x224   : > { %2916 = vmatmul.msk.f32.vlgmr.msrb.gmra.mxu2 %vm593_vm2, %v5171_v8  ;;  %1908 = vmatpush.xpose.msra.mxu3 %v3790_v47 }
 0x225   : > { %1851 = vmatpush.xpose.msra.mxu2 %v4051_v50  ;;  %v5258_v50 = vld [vmem:[#allocation18_spill] sm:$0xff]  ;;  %2262 = vmatpush.xpose.msrb.mxu0 %v4317_v33  ;;  %v4345_v35 = vsub.f32 %v2098_v58, %v4333_v5 }
 0x226   : > { %v2058_v31 = vmul.f32 %v5258_v50, %v5258_v50  ;;  %1771 = vmatpush.xpose.msra.mxu1 %v1770_v17  ;;  %v2057_v17 = vmul.f32 %v5259_v54, %v5259_v54  ;;  %v1793_v50 = vsub.f32 %v4144_v24, %v1792_v41  ;;  %v5261_v54 = vld [vmem:[#allocation15_spill] sm:$0xff] }
 0x227   : > { %v2055_v41 = vmul.f32 %v5261_v54, %v5261_v54 }
 0x228   : > { %1910 = vmatpush.xpose.msra.mxu3 %v3813_v48  ;;  %v2095_v37 = vsel %vm593_vm2, %v2058_v31, 0  ;;  %v2092_v28 = vsel %vm593_vm2, %v2057_v17, 0  ;;  %v5260_v31 = vld [vmem:[#allocation16_spill] sm:$0xff]  ;;  %v1799_v17 = vsub.f32 %v4164_v43, %v1798_v3  ;;  %v1805_v3 = vsub.f32 %v4178_v27, %v1804_v61 }
 0x229   : > { %1854 = vmatpush.xpose.msra.mxu2 %v4065_v39  ;;  %v1782_v39 = vand.u32 4294901760, %v1781_v30  ;;  %2265 = vmatpush.xpose.msrb.mxu0 %v4331_v34  ;;  %v4347_v6 = vand.u32 4294901760, %v2095_v37  ;;  %v4361_v58 = vand.u32 4294901760, %v2092_v28  ;;  %v1811_v61 = vsub.f32 %v4189_v32, %v1810_v56 }
 0x22a   : > { %1777 = vmatpush.xpose.msra.mxu1 %v1776_v40  ;;  %v2056_v40 = vmul.f32 %v5260_v31, %v5260_v31  ;;  %v2086_v31 = vsel %vm593_vm2, %v2055_v41, 0  ;;  %v1806_v54 = vand.u32 4294901760, %v1805_v3  ;;  %v5265_v56 = vand.u32 4294901760, %v4200_v7 }
 0x22b   : > { %v4359_v30 = vsub.f32 %v2095_v37, %v4347_v6  ;;  %v5262_v37 = vld [vmem:[#allocation14_spill] sm:$0xff] }
 0x22c   : > { %1912 = vmatpush.xpose.msra.mxu3 %v3835_v1 }
 0x22d   : > { %1857 = vmatpush.xpose.msra.mxu2 %v4073_v14  ;;  %v1788_v14 = vand.u32 4294901760, %v1787_v4  ;;  %2268 = vmatpush.xpose.msrb.mxu0 %v4345_v35  ;;  %v4373_v4 = vsub.f32 %v2092_v28, %v4361_v58  ;;  %v4390_v28 = vand.u32 4294901760, %v2086_v31 }
 0x22e   : > { %1783 = vmatpush.xpose.msra.mxu1 %v1782_v39  ;;  %v2089_v39 = vsel %vm593_vm2, %v2056_v40, 0  ;;  %v5263_v40 = vld [vmem:[#allocation13_spill] sm:$0xff] }
 0x230   : > { %1914 = vmatpush.xpose.msra.mxu3 %v3857_v38 }
 0x231   : > { %1860 = vmatpush.xpose.msra.mxu2 %v4084_v0  ;;  %v1794_v0 = vand.u32 4294901760, %v1793_v50  ;;  %2271 = vmatpush.xpose.msrb.mxu0 %v4359_v30  ;;  %v1800_v50 = vand.u32 4294901760, %v1799_v17 }
 0x232   : > { %1789 = vmatpush.xpose.msra.mxu1 %v1788_v14  ;;  %v2054_v14 = vmul.f32 %v5262_v37, %v5262_v37 }
 0x234   : > { %1916 = vmatpush.xpose.msra.mxu3 %v3879_v26  ;;  %v2083_v41 = vsel %vm593_vm2, %v2054_v14, 0  ;;  %v1817_v14 = vsub.f32 %v4200_v7, %v5265_v56 }
 0x235   : > { %1863 = vmatpush.xpose.msra.mxu2 %v4095_v2  ;;  %v4376_v2 = vand.u32 4294901760, %v2089_v39  ;;  %2274 = vmatpush.xpose.msrb.mxu0 %v4373_v4  ;;  %v4404_v17 = vand.u32 4294901760, %v2083_v41 }
 0x236   : > { %1795 = vmatpush.xpose.msra.mxu1 %v1794_v0  ;;  %v2053_v0 = vmul.f32 %v5263_v40, %v5263_v40  ;;  %v5266_v40 = vld [vmem:[#allocation11_spill] sm:$0xff] }
 0x238   : > { %1918 = vmatpush.xpose.msra.mxu3 %v3901_v23  ;;  %v2080_v3 = vsel %vm593_vm2, %v2053_v0, 0 }
 0x239   : > { %1866 = vmatpush.xpose.msra.mxu2 %v4107_v10  ;;  %v4388_v10 = vsub.f32 %v2089_v39, %v4376_v2  ;;  %v5264_v39 = vld [vmem:[#allocation12_spill] sm:$0xff] }
 0x23a   : > { %1801 = vmatpush.xpose.msra.mxu1 %v1800_v50  ;;  %v2052_v37 = vmul.f32 %v5264_v39, %v5264_v39  ;;  %v1812_v50 = vand.u32 4294901760, %v1811_v61  ;;  %v1818_v61 = vand.u32 4294901760, %v1817_v14  ;;  %v5267_v39 = vand.u32 4294901760, %v4215_v55 }
 0x23b   : > { %2277 = vmatpush.xpose.msrb.mxu0 %v4388_v10 }
 0x23c   : > { %1920 = vmatpush.xpose.msra.mxu3 %v3923_v36  ;;  %v1823_v0 = vsub.f32 %v4215_v55, %v5267_v39  ;;  %v2077_v56 = vsel %vm593_vm2, %v2052_v37, 0  ;;  %v5269_v39 = vand.u32 4294901760, %v4225_v15 }
 0x23d   : > { %1869 = vmatpush.xpose.msra.mxu2 %v4125_v52  ;;  %v4402_v52 = vsub.f32 %v2086_v31, %v4390_v28  ;;  %v4418_v31 = vand.u32 4294901760, %v2080_v3 }
 0x23e   : > { %1807 = vmatpush.xpose.msra.mxu1 %v1806_v54  ;;  %v2051_v54 = vmul.f32 %v5266_v40, %v5266_v40  ;;  %v1824_v14 = vand.u32 4294901760, %v1823_v0  ;;  %v1829_v37 = vsub.f32 %v4225_v15, %v5269_v39 }
 0x23f   : > { %2280 = vmatpush.xpose.msrb.mxu0 %v4402_v52 }
 0x240   : > { %1922 = vmatpush.xpose.msra.mxu3 %v3945_v21  ;;  %v2074_v8 = vsel %vm593_vm2, %v2051_v54, 0  ;;  %v1830_v0 = vand.u32 4294901760, %v1829_v37  ;;  %v1835_v54 = vsub.f32 %v4241_v16, %v1834_v60 }
 0x241   : > { %1872 = vmatpush.xpose.msra.mxu2 %v4144_v24  ;;  %v4416_v24 = vsub.f32 %v2083_v41, %v4404_v17  ;;  %v4432_v41 = vand.u32 4294901760, %v2077_v56 }
 0x242   : > { %1813 = vmatpush.xpose.msra.mxu1 %v1812_v50  ;;  %v5268_v50 = vld [vmem:[#allocation10_spill] sm:$0xff]  ;;  %v1836_v60 = vand.u32 4294901760, %v1835_v54 }
 0x243   : > { %2283 = vmatpush.xpose.msrb.mxu0 %v4416_v24  ;;  %v2050_v40 = vmul.f32 %v5268_v50, %v5268_v50 }
 0x244   : > { %1924 = vmatpush.xpose.msra.mxu3 %v3967_v18 }
 0x245   : > { %1875 = vmatpush.xpose.msra.mxu2 %v4164_v43  ;;  %v4430_v43 = vsub.f32 %v2080_v3, %v4418_v31  ;;  %v4446_v3 = vand.u32 4294901760, %v2074_v8  ;;  %v2071_v39 = vsel %vm593_vm2, %v2050_v40, 0  ;;  %v1841_v40 = vsub.f32 %v4260_v20, %v1840_v49 }
 0x246   : > { %1819 = vmatpush.xpose.msra.mxu1 %v1818_v61  ;;  %v5270_v61 = vld [vmem:[#allocation9_spill] sm:$0xff] }
 0x247   : > { %2286 = vmatpush.xpose.msrb.mxu0 %v4430_v43  ;;  %v2049_v50 = vmul.f32 %v5270_v61, %v5270_v61  ;;  %v5271_v61 = vld [vmem:[#allocation8_spill] sm:$0xff]  ;;  %v1842_v49 = vand.u32 4294901760, %v1841_v40 }
 0x248   : > { %1926 = vmatpush.xpose.msra.mxu3 %v3987_v63  ;;  %v2048_v37 = vmul.f32 %v5271_v61, %v5271_v61 }
 0x249   : > { %1878 = vmatpush.xpose.msra.mxu2 %v4178_v27  ;;  %v4444_v27 = vsub.f32 %v2077_v56, %v4432_v41  ;;  %v4459_v56 = vsub.f32 %v2074_v8, %v4446_v3 }
 0x24a   : > { %1825 = vmatpush.xpose.msra.mxu1 %v1824_v14  ;;  %v4461_v14 = vand.u32 4294901760, %v2071_v39 }
 0x24b   : > { %2289 = vmatpush.xpose.msrb.mxu0 %v4444_v27 }
 0x24c   : > { %1928 = vmatpush.xpose.msra.mxu3 %v4006_v53  ;;  %v4477_v61 = vsub.f32 %v2071_v39, %v4461_v14 }
 0x24d   : > { %1881 = vmatpush.xpose.msra.mxu2 %v4189_v32  ;;  %v2068_v32 = vsel %vm593_vm2, %v2049_v50, 0  ;;  %v2065_v50 = vsel %vm593_vm2, %v2048_v37, 0 }
 0x24e   : > { %1831 = vmatpush.xpose.msra.mxu1 %v1830_v0  ;;  %v2161_v0 = vand.u32 4294901760, %v4300_v29  ;;  %v4479_v54 = vand.u32 4294901760, %v2068_v32  ;;  %v4493_v39 = vand.u32 4294901760, %v2065_v50 }
 0x24f   : > { %2292 = vmatpush.xpose.msrb.mxu0 %v4459_v56 }
 0x250   : > { %1930 = vmatpush.xpose.msra.mxu3 %v4023_v59 }
 0x251   : > { %1884 = vmatpush.xpose.msra.mxu2 %v4200_v7  ;;  %v5272_v7 = vand.u32 4294901760, %v4276_v19 }
 0x252   : > { %1837 = vmatpush.xpose.msra.mxu1 %v1836_v60  ;;  %v2167_v60 = vand.u32 4294901760, %v4317_v33 }
 0x253   : > { %v2156_v8 = vsub.f32 %v4276_v19, %v5272_v7  ;;  %2295 = vmatpush.xpose.msrb.mxu0 %v4477_v61  ;;  %v2162_v7 = vsub.f32 %v4300_v29, %v2161_v0 }
 0x254   : > { %1932 = vmatpush.xpose.msra.mxu3 %v4037_v62  ;;  %v2168_v40 = vsub.f32 %v4317_v33, %v2167_v60 }
 0x255   : > { %1887 = vmatpush.xpose.msra.mxu2 %v4215_v55  ;;  %v2157_v12 = vand.u32 4294901760, %v2156_v8  ;;  %v4491_v55 = vsub.f32 %v2068_v32, %v4479_v54  ;;  %v2163_v37 = vand.u32 4294901760, %v2162_v7  ;;  %v5273_v32 = vand.u32 4294901760, %v4153_v22 }
 0x256   : > { %1843 = vmatpush.xpose.msra.mxu1 %v1842_v49  ;;  %v2185_v8 = vand.u32 4294901760, %v4359_v30 }
 0x257   : > { %2298 = vmatpush.xpose.msrb.mxu0 %v4491_v55 }
 0x258   : > { %1934 = vmatpush.xpose.msra.mxu3 %v4056_v13 }
 0x259   : > { %1890 = vmatpush.xpose.msra.mxu2 %v4225_v15  ;;  %1845 = vmatmul.f32.vlgmr.msra.gmra.mxu1 %v4131_v57  ;;  %v2173_v15 = vand.u32 4294901760, %v4331_v34 }
 0x25a   : > { %2012 = vmatpush.xpose.msrb.mxu1 %v3751_v45  ;;  %v4504_v45 = vsub.f32 %v2065_v50, %v4493_v39 }
 0x25b   : > { %1938 = vmatmul.f32.vlgmr.msra.gmra.mxu3 %v5273_v32 }
 0x25c   : > { %2158 = vmatpush.xpose.msrb.mxu3 %v2157_v12  ;;  %2301 = vmatpush.xpose.msrb.mxu0 %v4504_v45  ;;  %v2169_v12 = vand.u32 4294901760, %v2168_v40 }
 0x25d   : > { %1893 = vmatpush.xpose.msra.mxu2 %v4241_v16  ;;  %v2179_v16 = vand.u32 4294901760, %v4345_v35 }
 0x25e   : > { %2014 = vmatpush.xpose.msrb.mxu1 %v3766_v44  ;;  %v2174_v44 = vsub.f32 %v4331_v34, %v2173_v15 }
 0x25f   : > { %2304 = vmatmul.f32.vlgmr.msrb.gmra.mxu0 %v4119_v46 }
 0x260   : > { %2164 = vmatpush.xpose.msrb.mxu3 %v2163_v37 }
 0x261   : > { %1896 = vmatpush.xpose.msra.mxu2 %v4260_v20  ;;  %v2175_v20 = vand.u32 4294901760, %v2174_v44 }
 0x262   : > { %2016 = vmatpush.xpose.msrb.mxu1 %v3790_v47  ;;  %v2180_v47 = vsub.f32 %v4345_v35, %v2179_v16 }
 0x264   : > { %2170 = vmatpush.xpose.msrb.mxu3 %v2169_v12  ;;  %1899 = vmatmul.f32.vlgmr.msra.gmra.mxu2 %v4153_v22  ;;  %v2181_v46 = vand.u32 4294901760, %v2180_v47  ;;  %v2186_v22 = vsub.f32 %v4359_v30, %v2185_v8  ;;  %v573_v30 = vlaneseq }
 0x265   : > { %2113 = vmatpush.xpose.msrb.mxu2 %v4256_v11 }
 0x266   : > { %2018 = vmatpush.xpose.msrb.mxu1 %v3813_v48  ;;  %v2191_v48 = vand.u32 4294901760, %v4373_v4  ;;  %v2187_v49 = vand.u32 4294901760, %v2186_v22 }
 0x268   : > { %2176 = vmatpush.xpose.msrb.mxu3 %v2175_v20  ;;  %v2192_v50 = vsub.f32 %v4373_v4, %v2191_v48  ;;  %v4639_v4 = vand.u32 127, %v573_v30 }
 0x269   : > { %2115 = vmatpush.xpose.msrb.mxu2 %v4283_v25 }
 0x26a   : > { %2020 = vmatpush.xpose.msrb.mxu1 %v3835_v1  ;;  %v2197_v1 = vand.u32 4294901760, %v4388_v10  ;;  %v2193_v7 = vand.u32 4294901760, %v2192_v50 }
 0x26c   : > { %2182 = vmatpush.xpose.msrb.mxu3 %v2181_v46  ;;  %v2198_v37 = vsub.f32 %v4388_v10, %v2197_v1 }
 0x26d   : > { %2117 = vmatpush.xpose.msrb.mxu2 %v4302_v51 }
 0x26e   : > { %2022 = vmatpush.xpose.msrb.mxu1 %v3857_v38  ;;  %v2203_v38 = vand.u32 4294901760, %v4402_v52  ;;  %v2199_v40 = vand.u32 4294901760, %v2198_v37 }
 0x270   : > { %2188 = vmatpush.xpose.msrb.mxu3 %v2187_v49  ;;  %v2204_v32 = vsub.f32 %v4402_v52, %v2203_v38 }
 0x271   : > { %2119 = vmatpush.xpose.msrb.mxu2 %v4319_v9 }
 0x272   : > { %2024 = vmatpush.xpose.msrb.mxu1 %v3879_v26  ;;  %v2209_v26 = vand.u32 4294901760, %v4416_v24  ;;  %v2205_v12 = vand.u32 4294901760, %v2204_v32  ;;  %v784_v32 = vpop.f32.mrf.mxu2 }
 0x274   : > { %2194 = vmatpush.xpose.msrb.mxu3 %v2193_v7  ;;  %v2210_v44 = vsub.f32 %v4416_v24, %v2209_v26  ;;  %v683_v7 = vpop.f32.mrf.mxu1 }
 0x275   : > { %2121 = vmatpush.xpose.msrb.mxu2 %v4333_v5  ;;  %v785_v33 = vadd.f32 %v784_v32, %v683_v7 }
 0x276   : > { %2026 = vmatpush.xpose.msrb.mxu1 %v3901_v23  ;;  %v2215_v23 = vand.u32 4294901760, %v4430_v43  ;;  %v2211_v20 = vand.u32 4294901760, %v2210_v44  ;;  %v2245_v44 = vand.u32 4294901760, %v4504_v45 }
 0x278   : > { %2200 = vmatpush.xpose.msrb.mxu3 %v2199_v40  ;;  %v2216_v47 = vsub.f32 %v4430_v43, %v2215_v23  ;;  %v2239_v40 = vand.u32 4294901760, %v4491_v55  ;;  %v5279_v43 = vmov 0  }
 0x279   : > { %2123 = vmatpush.xpose.msrb.mxu2 %v4347_v6 }
 0x27a   : > { %2028 = vmatpush.xpose.msrb.mxu1 %v3923_v36  ;;  %v2221_v36 = vand.u32 4294901760, %v4444_v27  ;;  %v2217_v46 = vand.u32 4294901760, %v2216_v47 }
 0x27c   : > { %2206 = vmatpush.xpose.msrb.mxu3 %v2205_v12  ;;  %v2222_v22 = vsub.f32 %v4444_v27, %v2221_v36 }
 0x27d   : > { %2125 = vmatpush.xpose.msrb.mxu2 %v4361_v58 }
 0x27e   : > { %2030 = vmatpush.xpose.msrb.mxu1 %v3945_v21  ;;  %v2227_v21 = vand.u32 4294901760, %v4459_v56  ;;  %v2223_v49 = vand.u32 4294901760, %v2222_v22  ;;  %v946_v22 = vpop.f32.mrf.mxu2 }
 0x280   : > { %2212 = vmatpush.xpose.msrb.mxu3 %v2211_v20  ;;  %v2228_v50 = vsub.f32 %v4459_v56, %v2227_v21  ;;  %v838_v20 = vpop.f32.mrf.mxu3  ;;  %v1745_v56 = vpop.f32.mrf.mxu0 }
 0x281   : > { %2127 = vmatpush.xpose.msrb.mxu2 %v4376_v2  ;;  %v839_v34 = vadd.f32 %v838_v20, %v785_v33 }
 0x282   : > { %2032 = vmatpush.xpose.msrb.mxu1 %v3967_v18  ;;  %v2233_v18 = vand.u32 4294901760, %v4477_v61  ;;  %v2229_v37 = vand.u32 4294901760, %v2228_v50  ;;  %v5274_v50 = vmov 1.0  }
 0x284   : > { %2218 = vmatpush.xpose.msrb.mxu3 %v2217_v46  ;;  %v877_v46 = vpop.f32.mrf.mxu1 }
 0x285   : > { %2129 = vmatpush.xpose.msrb.mxu2 %v4390_v28 }
 0x286   : > { %2034 = vmatpush.xpose.msrb.mxu1 %v3987_v63  ;;  %v2234_v63 = vsub.f32 %v4477_v61, %v2233_v18 }
 0x288   : > { %2224 = vmatpush.xpose.msrb.mxu3 %v2223_v49  ;;  %v2235_v12 = vand.u32 4294901760, %v2234_v63 }
 0x289   : > { %2131 = vmatpush.xpose.msrb.mxu2 %v4404_v17 }
 0x28a   : > { %2036 = vmatpush.xpose.msrb.mxu1 %v4006_v53  ;;  %v2240_v53 = vsub.f32 %v4491_v55, %v2239_v40 }
 0x28c   : > { %2230 = vmatpush.xpose.msrb.mxu3 %v2229_v37  ;;  %v2241_v47 = vand.u32 4294901760, %v2240_v53  ;;  %v1091_v37 = vpop.f32.mrf.mxu1 }
 0x28d   : > { %2133 = vmatpush.xpose.msrb.mxu2 %v4418_v31 }
 0x28e   : > { %2038 = vmatpush.xpose.msrb.mxu1 %v4023_v59  ;;  %v2246_v59 = vsub.f32 %v4504_v45, %v2245_v44 }
 0x290   : > { %2236 = vmatpush.xpose.msrb.mxu3 %v2235_v12  ;;  %v2247_v49 = vand.u32 4294901760, %v2246_v59 }
 0x291   : > { %2135 = vmatpush.xpose.msrb.mxu2 %v4432_v41 }
 0x292   : > { %2040 = vmatpush.xpose.msrb.mxu1 %v4037_v62  ;;  %v983_v62 = vpop.f32.mrf.mxu3 }
 0x294   : > { %2242 = vmatpush.xpose.msrb.mxu3 %v2241_v47 }
 0x295   : > { %2137 = vmatpush.xpose.msrb.mxu2 %v4446_v3 }
 0x296   : > { %2042 = vmatpush.xpose.msrb.mxu1 %v4056_v13  ;;  %v1192_v13 = vpop.f32.mrf.mxu2  ;;  %v1285_v12 = vpop.f32.mrf.mxu1 }
 0x298   : > { %2248 = vmatpush.xpose.msrb.mxu3 %v2247_v49 }
 0x299   : > { %2139 = vmatpush.xpose.msrb.mxu2 %v4461_v14  ;;  %2044 = vmatmul.f32.vlgmr.msrb.gmra.mxu1 %v4131_v57  ;;  %v1193_v57 = vadd.f32 %v1192_v13, %v1091_v37 }
 0x29a   : > { %2309 = vmatpush.xpose.msra.mxu1 %v4256_v11  ;;  %v1246_v63 = vpop.f32.mrf.mxu3 }
 0x29b   : > { %2921 = vmatmul.msk.f32.vlgmr.msrb.gmra.mxu3 %vm593_vm2, %v5274_v50 }
 0x29c   : > { %2417 = vmatpush.xpose.msra.mxu3 %v4256_v11  ;;  %v5275_v11 = vand.u32 4294901760, %v4276_v19 }
 0x29d   : > { %2141 = vmatpush.xpose.msrb.mxu2 %v4479_v54 }
 0x29e   : > { %2311 = vmatpush.xpose.msra.mxu1 %v4283_v25 }
 0x2a0   : > { %2419 = vmatpush.xpose.msra.mxu3 %v4283_v25  ;;  %v1247_v25 = vadd.f32 %v1246_v63, %v1193_v57 }
 0x2a1   : > { %2143 = vmatpush.xpose.msrb.mxu2 %v4493_v39 }
 0x2a2   : > { %2313 = vmatpush.xpose.msra.mxu1 %v4302_v51  ;;  %v1286_v19 = vadd.f32 %v1285_v12, %v1247_v25 }
 0x2a4   : > { %2421 = vmatpush.xpose.msra.mxu3 %v4302_v51  ;;  %2149 = vmatmul.f32.vlgmr.msrb.gmra.mxu2 %v4150_v42  ;;  %v1391_v42 = vpop.f32.mrf.mxu3 }
 0x2a5   : > { %2350 = vmatpush.xpose.msra.mxu2 %v5275_v11 }
 0x2a6   : > { %2315 = vmatpush.xpose.msra.mxu1 %v4319_v9 }
 0x2a7   : > { %v1354_v51 = vpop.f32.mrf.mxu2 }
 0x2a8   : > { %2423 = vmatpush.xpose.msra.mxu3 %v4319_v9  ;;  %v1355_v53 = vadd.f32 %v1354_v51, %v1286_v19 }
 0x2a9   : > { %2354 = vmatpush.xpose.msra.mxu2 %v2161_v0 }
 0x2aa   : > { %2317 = vmatpush.xpose.msra.mxu1 %v4333_v5  ;;  %v1392_v29 = vadd.f32 %v1391_v42, %v1355_v53 }
 0x2ac   : > { %2425 = vmatpush.xpose.msra.mxu3 %v4333_v5  ;;  %v1394_v9 = vmax.f32 %v1392_v29, 1e-24 }
 0x2ad   : > { %2358 = vmatpush.xpose.msra.mxu2 %v2167_v60 }
 0x2ae   : > { %2319 = vmatpush.xpose.msra.mxu1 %v4347_v6  ;;  %2998 = vrsqrt.f32 %v1394_v9  ;;  %vm1401_vm4 = vweird.f32 %v1394_v9 }
 0x2b0   : > { %2427 = vmatpush.xpose.msra.mxu3 %v4347_v6  ;;  %v878_v6 = vadd.f32 %v877_v46, %v839_v34  ;;  %v5280_v34 = vmov 0 }
 0x2b1   : > { %2362 = vmatpush.xpose.msra.mxu2 %v2173_v15  ;;  %v1408_v15 = vstv %s1407_s8 }
 0x2b2   : > { %2321 = vmatpush.xpose.msra.mxu1 %v4361_v58  ;;  %vm1409_vm6 = vcmp.lt.s32.totalorder %v4639_v4, %v1408_v15 }
 0x2b4   : > { %2429 = vmatpush.xpose.msra.mxu3 %v4361_v58  ;;  %v2999_v5 = vpop.eup %2998 }
 0x2b5   : > { %2366 = vmatpush.xpose.msra.mxu2 %v2179_v16  ;;  %v1396_v35 = vmul.f32 %v2999_v5, %v1394_v9  ;;  %vm1402_vm3 = vweird.f32 %v2999_v5  ;;  %v2467_v9 = vstv %s2466_s10 }
 0x2b6   : > { %2323 = vmatpush.xpose.msra.mxu1 %v4376_v2  ;;  %vm1403_vm5 = vmor %vm1401_vm4, %vm1402_vm3  ;;  %vm2468_vm12 = vcmp.lt.s32.totalorder %v4639_v4, %v2467_v9 }
 0x2b7   : > { %v1397_v58 = vmul.f32 %v2999_v5, %v1396_v35 }
 0x2b8   : > { %2431 = vmatpush.xpose.msra.mxu3 %v4376_v2  ;;  %v947_v2 = vadd.f32 %v946_v22, %v878_v6  ;;  %v4708_v6 = vshrl.u32 %v573_v30, 7 }
 0x2b9   : > { %2370 = vmatpush.xpose.msra.mxu2 %v2185_v8  ;;  %v1398_v0 = vmul.f32 0.5, %v1397_v58 }
 0x2ba   : > { %2325 = vmatpush.xpose.msra.mxu1 %v4390_v28  ;;  %v984_v10 = vadd.f32 %v983_v62, %v947_v2  ;;  %v4711_v58 = vadd.s32 24, %v4708_v6  ;;  %v4733_v15 = vadd.s32 32, %v4708_v6 }
 0x2bb   : > { %v1399_v60 = vsub.f32 1.5, %v1398_v0 }
 0x2bc   : > { %2433 = vmatpush.xpose.msra.mxu3 %v4390_v28  ;;  %vm5174_vm15 = vcmp.lt.s32.totalorder %v4711_v58, %v4639_v4 }
 0x2bd   : > { %2374 = vmatpush.xpose.msra.mxu2 %v2191_v48  ;;  %v1400_v28 = vmul.f32 %v2999_v5, %v1399_v60 }
 0x2be   : > { %2327 = vmatpush.xpose.msra.mxu1 %v4404_v17 }
 0x2bf   : > { %v1404_v16 = vsel %vm1403_vm5, %v2999_v5, %v1400_v28  ;;  %v4730_v28 = vadd.s32 8, %v4708_v6  ;;  %vm5175_vm5 = vcmp.lt.s32.totalorder %v4733_v15, %v4639_v4 }
 0x2c0   : > { %2435 = vmatpush.xpose.msra.mxu3 %v4404_v17  ;;  %v4645_v17 = vmul.f32 %v1404_v16, %v984_v10 }
 0x2c1   : > { %2378 = vmatpush.xpose.msra.mxu2 %v2197_v1  ;;  %vm1559_vm4 = vcmp.lt.s32.totalorder %v4730_v28, %v4639_v4 }
 0x2c2   : > { %2329 = vmatpush.xpose.msra.mxu1 %v4418_v31  ;;  %vm1410_vm7 = vcmp.eq.f32.partialorder %v4645_v17, %v4645_v17 }
 0x2c3   : > { %vm4651_vm8 = vmand %vm1409_vm6, %vm1410_vm7 }
 0x2c4   : > { %2437 = vmatpush.xpose.msra.mxu3 %v4418_v31  ;;  %v4661_v24 = vsel %vm4651_vm8, %v4645_v17, -3.0  ;;  %v5278_v31 = vld [vmem:[#allocation31_spill] sm:$0xff] }
 0x2c5   : > { %2382 = vmatpush.xpose.msra.mxu2 %v2203_v38  ;;  %1413 = vxpose.xlu0.b32.start.end [1/1] (short) %v4661_v24, 128  ;;  %v4716_v2 = vperm.slane %v4661_v24, 0 }
 0x2c6   : > { %2331 = vmatpush.xpose.msra.mxu1 %v4432_v41 }
 0x2c8   : > { %2439 = vmatpush.xpose.msra.mxu3 %v4432_v41 }
 0x2c9   : > { %2386 = vmatpush.xpose.msra.mxu2 %v2209_v26 }
 0x2ca   : > { %2333 = vmatpush.xpose.msra.mxu1 %v4446_v3 }
 0x2cc   : > { %2441 = vmatpush.xpose.msra.mxu3 %v4446_v3 }
 0x2cd   : > { %2390 = vmatpush.xpose.msra.mxu2 %v2215_v23 }
 0x2ce   : > { %2335 = vmatpush.xpose.msra.mxu1 %v4461_v14 }
 0x2d0   : > { %2443 = vmatpush.xpose.msra.mxu3 %v4461_v14 }
 0x2d1   : > { %2394 = vmatpush.xpose.msra.mxu2 %v2221_v36 }
 0x2d2   : > { %2337 = vmatpush.xpose.msra.mxu1 %v4479_v54 }
 0x2d4   : > { %2445 = vmatpush.xpose.msra.mxu3 %v4479_v54 }
 0x2d5   : > { %2398 = vmatpush.xpose.msra.mxu2 %v2227_v21 }
 0x2d6   : > { %2339 = vmatpush.xpose.msra.mxu1 %v4493_v39  ;;  %v1846_v14 = vpop.f32.mrf.mxu1 }
 0x2d7   : > { %v1847_v62 = vadd.f32 %v1846_v14, %v1745_v56  ;;  %v4768_v56 = vadd.s32 48, %v4708_v6 }
 0x2d8   : > { %2447 = vmatpush.xpose.msra.mxu3 %v4493_v39  ;;  %v2008_v39 = vpop.f32.mrf.mxu0 }
 0x2d9   : > { %2402 = vmatpush.xpose.msra.mxu2 %v2233_v18  ;;  %2343 = vmatmul.f32.vlgmr.msra.gmra.mxu1 %v5278_v31 }
 0x2db   : > { %2923 = vmatmul.msk.f32.vlgmr.msra.gmra.mxu3 %vm593_vm2, %v5274_v50 }
 0x2dd   : > { %2406 = vmatpush.xpose.msra.mxu2 %v2239_v40 }
 0x2de   : > { %v1939_v61 = vpop.f32.mrf.mxu3 }
 0x2e0   : > { %v2305_v26 = vpop.f32.mrf.mxu0 }
 0x2e1   : > { %2410 = vmatpush.xpose.msra.mxu2 %v2245_v44 }
 0x2e4   : > { %2922 = vmatmul.msk.f32.vlgmr.msra.gmra.mxu2 %vm593_vm2, %v5274_v50 }
 0x2e7   : > { %v1900_v55 = vpop.f32.mrf.mxu2 }
 0x2e8   : > { %v1901_v13 = vadd.f32 %v1900_v55, %v1847_v62 }
 0x2ea   : > { %v1940_v57 = vadd.f32 %v1939_v61, %v1901_v13 }
 0x2ec   : > { %v2009_v12 = vadd.f32 %v2008_v39, %v1940_v57  ;;  %v4782_v39 = vadd.s32 40, %v4708_v6  ;;  %v4856_v57 = vadd.s32 104, %v4708_v6 }
 0x316   : > { %v2045_v8 = vpop.f32.mrf.mxu1 }
 0x317   : > { %v2046_v51 = vadd.f32 %v2045_v8, %v2009_v12 }
 0x31e   : > { %v2251_v48 = vpop.f32.mrf.mxu3 }
 0x327   : > { %v2150_v1 = vpop.f32.mrf.mxu2 }
 0x328   : > { %v2252_v38 = vadd.f32 %v2251_v48, %v2150_v1 }
 0x32a   : > { %v2306_v23 = vadd.f32 %v2305_v26, %v2252_v38  ;;  %v4796_v38 = vadd.s32 56, %v4708_v6  ;;  %v4801_v26 = vadd.s32 64, %v4708_v6 }
 0x32c   : > { %2995 = vset.pattern.permute.xlu0 %v5279_v43 }
 0x356   : > { %v2344_v21 = vpop.f32.mrf.mxu1 }
 0x357   : > { %v2345_v18 = vadd.f32 %v2344_v21, %v2306_v23 }
 0x35e   : > { %v2450_v44 = vpop.f32.mrf.mxu3 }
 0x367   : > { %v2413_v7 = vpop.f32.mrf.mxu2 }
 0x368   : > { %v2414_v40 = vadd.f32 %v2413_v7, %v2345_v18 }
 0x369   : > { %v1429_v41 = vpop.trf.xlu0 }
 0x36a   : > { %v2451_v20 = vadd.f32 %v2450_v44, %v2414_v40 }
 0x36c   : > { %v2453_v47 = vmax.f32 %v2451_v20, 1e-24 }
 0x36e   : > { %3000 = vrsqrt.f32 %v2453_v47  ;;  %vm2460_vm9 = vweird.f32 %v2453_v47 }
 0x371   : > { %v1430_v27 = vpop.trf.xlu0 }
 0x372   : > { %1452 = vperm.xlu1 %2996, %v1430_v27  }
 0x374   : > { %v3001_v22 = vpop.eup %3000 }
 0x375   : > { %v2455_v49 = vmul.f32 %v3001_v22, %v2453_v47  ;;  %vm2461_vm10 = vweird.f32 %v3001_v22 }
 0x376   : > { %vm2462_vm11 = vmor %vm2460_vm9, %vm2461_vm10 }
 0x377   : > { %v2456_v37 = vmul.f32 %v3001_v22, %v2455_v49 }
 0x379   : > { %v1431_v3 = vpop.trf.xlu0  ;;  %v2457_v11 = vmul.f32 0.5, %v2456_v37 }
 0x37a   : > { %1457 = vperm.xlu1 %2996, %v1431_v3  }
 0x37b   : > { %v2458_v25 = vsub.f32 1.5, %v2457_v11 }
 0x37d   : > { %v2459_v19 = vmul.f32 %v3001_v22, %v2458_v25 }
 0x37f   : > { %v2463_v53 = vsel %vm2462_vm11, %v3001_v22, %v2459_v19 }
 0x380   : > { %v4690_v29 = vmul.f32 %v2463_v53, %v2046_v51  ;;  %v4869_v51 = vadd.s32 120, %v4708_v6 }
 0x381   : > { %v1432_v54 = vpop.trf.xlu0 }
 0x382   : > { %1462 = vperm.xlu2 %2997, %v1432_v54   ;;  %vm2469_vm13 = vcmp.eq.f32.partialorder %v4690_v29, %v4690_v29 }
 0x383   : > { %vm4697_vm14 = vmand %vm2468_vm12, %vm2469_vm13 }
 0x384   : > { %v5281_v34 = vsel %vm4697_vm14, 4294967295, %v5280_v34  ;;  %v4704_v5 = vsel %vm4697_vm14, %v4690_v29, -3.0 }
 0x389   : > { %v1433_v45 = vpop.trf.xlu0 }
 0x38a   : > { %1467 = vperm.xlu2 %2997, %v1433_v45  }
 0x391   : > { %v1434_v36 = vpop.trf.xlu0 }
 0x392   : > { %1472 = vperm.xlu1 %2996, %v1434_v36  }
 0x399   : > { %v1435_v32 = vpop.trf.xlu0 }
 0x39a   : > { %1477 = vperm.xlu2 %2997, %v1435_v32   ;;  %v4827_v32 = vadd.s32 72, %v4708_v6 }
 0x3a1   : > { %v1436_v59 = vpop.trf.xlu0 }
 0x3a2   : > { %1482 = vperm.xlu1 %2996, %v1436_v59  }
 0x3a9   : > { %v1437_v46 = vpop.trf.xlu0 }
 0x3aa   : > { %1487 = vperm.xlu2 %2997, %v1437_v46  }
 0x3ab   : > { %1447 = vperm.xlu0 %2995, %v1429_v41   ;;  %v4751_v41 = vadd.s32 16, %v4708_v6 }
 0x3b1   : > { %v1438_v50 = vpop.trf.xlu0 }
 0x3b2   : > { %1492 = vperm.xlu1 %2996, %v1438_v50   ;;  %v4845_v50 = vadd.s32 88, %v4708_v6 }
 0x3b9   : > { %v4687_v63 = vpop.trf.xlu0 }
 0x3c1   : > { %v1440_v42 = vpop.trf.xlu0 }
 0x3c2   : > { %1502 = vperm.xlu1 %2996, %v1440_v42  }
 0x3c9   : > { %v4692_v33 = vpop.trf.xlu0 }
 0x3d0   : > { %2472 = vxpose.xlu2.b32.start.end [1/1] (short) %v4704_v5, 128 }
 0x3d1   : > { %v1442_v35 = vpop.trf.xlu0 }
 0x3d2   : > { %1512 = vperm.xlu1 %2996, %v1442_v35  }
 0x3d9   : > { %v4713_v0 = vpop.trf.xlu0 }
 0x3dc   : > { %v1463_v60 = vpop.permute.xlu2 %1462 }
 0x3dd   : > { %vm1529_vm0 = vcmp.gt.f32.partialorder %v1463_v60, %v4716_v2  ;;  %vm1545_vm1 = vcmp.eq.f32.partialorder %v1463_v60, %v4716_v2 }
 0x3de   : > { %vm1577_vm2 = vmand %vm1545_vm1, %vm5174_vm15  ;;  %vm1560_vm1 = vcmp.lt.s32.totalorder %v4751_v41, %v4639_v4  ;;  %v4923_v41 = vadd.s32 96, %v4708_v6 }
 0x3df   : > { %vm4725_vm3 = vmor %vm1529_vm0, %vm1577_vm2 }
 0x3e0   : > { %v1609_v21 = vsel %vm4725_vm3, 1, %v5279_v43 }
 0x3e1   : > { %v1444_v10 = vpop.trf.xlu0 }
 0x3e2   : > { %1522 = vperm.xlu1 %2996, %v1444_v10  }
 0x3e4   : > { %v1453_v16 = vpop.permute.xlu1 %1452  ;;  %v1468_v24 = vpop.permute.xlu2 %1467 }
 0x3e5   : > { %vm1527_vm6 = vcmp.gt.f32.partialorder %v1453_v16, %v4716_v2  ;;  %vm1543_vm7 = vcmp.eq.f32.partialorder %v1453_v16, %v4716_v2  ;;  %vm1530_vm9 = vcmp.gt.f32.partialorder %v1468_v24, %v4716_v2  ;;  %vm1546_vm10 = vcmp.eq.f32.partialorder %v1468_v24, %v4716_v2 }
 0x3e6   : > { %vm1575_vm11 = vmand %vm1543_vm7, %vm1559_vm4 }
 0x3e7   : > { %vm4746_vm12 = vmor %vm1527_vm6, %vm1575_vm11 }
 0x3e8   : > { %vm1578_vm13 = vmand %vm1546_vm10, %vm5175_vm5  ;;  %v1607_v45 = vsel %vm4746_vm12, 1, %v5279_v43 }
 0x3e9   : > { %vm4756_vm0 = vmor %vm1530_vm9, %vm1578_vm13  ;;  %vm5176_vm9 = vcmp.lt.s32.totalorder %v4768_v56, %v4639_v4 }
 0x3ea   : > { %v1610_v20 = vsel %vm4756_vm0, 1, %v5279_v43  ;;  %vm5180_vm0 = vcmp.lt.s32.totalorder %v4845_v50, %v4639_v4 }
 0x3ec   : > { %v1458_v3 = vpop.permute.xlu1 %1457 }
 0x3ed   : > { %vm1528_vm2 = vcmp.gt.f32.partialorder %v1458_v3, %v4716_v2  ;;  %vm1544_vm6 = vcmp.eq.f32.partialorder %v1458_v3, %v4716_v2 }
 0x3ee   : > { %vm1576_vm7 = vmand %vm1544_vm6, %vm1560_vm1 }
 0x3ef   : > { %vm1592_vm11 = vmor %vm1528_vm2, %vm1576_vm7  ;;  %vm1563_vm2 = vcmp.lt.s32.totalorder %v4782_v39, %v4639_v4 }
 0x3f0   : > { %v1608_v61 = vsel %vm1592_vm11, 1, %v5279_v43 }
 0x3f4   : > { %v1478_v14 = vpop.permute.xlu2 %1477 }
 0x3f5   : > { %vm1532_vm10 = vcmp.gt.f32.partialorder %v1478_v14, %v4716_v2  ;;  %vm1548_vm13 = vcmp.eq.f32.partialorder %v1478_v14, %v4716_v2 }
 0x3f6   : > { %vm1580_vm15 = vmand %vm1548_vm13, %vm5176_vm9 }
 0x3f7   : > { %vm1596_vm5 = vmor %vm1532_vm10, %vm1580_vm15 }
 0x3f8   : > { %v1612_v54 = vsel %vm1596_vm5, 1, %v5279_v43  ;;  %vm5177_vm5 = vcmp.lt.s32.totalorder %v4796_v38, %v4639_v4 }
 0x3f9   : > { %v4779_v55 = vadd.s32 %v1612_v54, %v1608_v61 }
 0x404   : > { %v1473_v8 = vpop.permute.xlu1 %1472  ;;  %v1488_v36 = vpop.permute.xlu2 %1487 }
 0x405   : > { %vm1531_vm6 = vcmp.gt.f32.partialorder %v1473_v8, %v4716_v2  ;;  %vm1547_vm7 = vcmp.eq.f32.partialorder %v1473_v8, %v4716_v2 }
 0x406   : > { %vm1579_vm15 = vmand %vm1547_vm7, %vm1563_vm2  ;;  %vm5178_vm7 = vcmp.lt.s32.totalorder %v4801_v26, %v4639_v4 }
 0x407   : > { %vm1595_vm11 = vmor %vm1531_vm6, %vm1579_vm15  ;;  %vm1550_vm15 = vcmp.eq.f32.partialorder %v1488_v36, %v4716_v2 }
 0x408   : > { %v1611_v48 = vsel %vm1595_vm11, 1, %v5279_v43  ;;  %vm1534_vm11 = vcmp.gt.f32.partialorder %v1488_v36, %v4716_v2  ;;  %vm1582_vm9 = vmand %vm1550_vm15, %vm5178_vm7 }
 0x409   : > { %v1623_v1 = vadd.s32 %v1611_v48, %v1607_v45 }
 0x414   : > { %v1483_v23 = vpop.permute.xlu1 %1482 }
 0x415   : > { %vm1533_vm10 = vcmp.gt.f32.partialorder %v1483_v23, %v4716_v2  ;;  %vm1549_vm13 = vcmp.eq.f32.partialorder %v1483_v23, %v4716_v2 }
 0x416   : > { %vm1581_vm12 = vmand %vm1549_vm13, %vm5177_vm5 }
 0x417   : > { %vm1597_vm6 = vmor %vm1533_vm10, %vm1581_vm12  ;;  %vm1558_vm10 = vcmp.lt.s32.totalorder %v4708_v6, %v4639_v4 }
 0x418   : > { %v1613_v18 = vsel %vm1597_vm6, 1, %v5279_v43  ;;  %vm1598_vm13 = vmor %vm1534_vm11, %vm1582_vm9  ;;  %vm1567_vm9 = vcmp.lt.s32.totalorder %v4827_v32, %v4639_v4 }
 0x419   : > { %v1625_v7 = vadd.s32 %v1613_v18, %v1609_v21  ;;  %v1614_v59 = vsel %vm1598_vm13, 1, %v5279_v43  ;;  %v4889_v21 = vperm.slane %v4704_v5, 0  ;;  %v4903_v5 = vadd.s32 80, %v4708_v6 }
 0x41d   : > { %v1448_v40 = vpop.permute.xlu0 %1447 }
 0x41e   : > { %vm1526_vm3 = vcmp.gt.f32.partialorder %v1448_v40, %v4716_v2  ;;  %vm1542_vm12 = vcmp.eq.f32.partialorder %v1448_v40, %v4716_v2 }
 0x41f   : > { %vm1574_vm6 = vmand %vm1542_vm12, %vm1558_vm10 }
 0x420   : > { %vm1590_vm5 = vmor %vm1526_vm3, %vm1574_vm6 }
 0x421   : > { %v1606_v44 = vsel %vm1590_vm5, 1, %v5279_v43 }
 0x422   : > { %v1622_v47 = vadd.s32 %v1610_v20, %v1606_v44 }
 0x424   : > { %v1493_v46 = vpop.permute.xlu1 %1492  ;;  %v4836_v22 = vadd.s32 %v1622_v47, %v1614_v59 }
 0x425   : > { %vm1535_vm15 = vcmp.gt.f32.partialorder %v1493_v46, %v4716_v2  ;;  %vm1551_vm11 = vcmp.eq.f32.partialorder %v1493_v46, %v4716_v2 }
 0x426   : > { %vm1583_vm5 = vmand %vm1551_vm11, %vm1567_vm9 }
 0x427   : > { %vm1599_vm3 = vmor %vm1535_vm15, %vm1583_vm5  ;;  %vm5181_vm15 = vcmp.lt.s32.totalorder %v4856_v57, %v4639_v4 }
 0x428   : > { %v1615_v49 = vsel %vm1599_vm3, 1, %v5279_v43 }
 0x429   : > { %v1627_v62 = vadd.s32 %v1623_v1, %v1615_v49 }
 0x434   : > { %v1503_v37 = vpop.permute.xlu1 %1502 }
 0x435   : > { %vm1537_vm13 = vcmp.gt.f32.partialorder %v1503_v37, %v4716_v2  ;;  %vm1553_vm12 = vcmp.eq.f32.partialorder %v1503_v37, %v4716_v2 }
 0x436   : > { %vm1585_vm6 = vmand %vm1553_vm12, %vm5180_vm0 }
 0x437   : > { %vm1601_vm11 = vmor %vm1537_vm13, %vm1585_vm6  ;;  %vm5179_vm13 = vcmp.lt.s32.totalorder %v4869_v51, %v4639_v4 }
 0x438   : > { %v1617_v13 = vsel %vm1601_vm11, 1, %v5279_v43 }
 0x439   : > { %v1629_v11 = vadd.s32 %v1625_v7, %v1617_v13 }
 0x444   : > { %v1513_v25 = vpop.permute.xlu1 %1512 }
 0x445   : > { %vm1539_vm5 = vcmp.gt.f32.partialorder %v1513_v25, %v4716_v2  ;;  %vm1555_vm3 = vcmp.eq.f32.partialorder %v1513_v25, %v4716_v2 }
 0x446   : > { %vm1587_vm7 = vmand %vm1555_vm3, %vm5181_vm15 }
 0x447   : > { %vm1603_vm12 = vmor %vm1539_vm5, %vm1587_vm7 }
 0x448   : > { %v1619_v12 = vsel %vm1603_vm12, 1, %v5279_v43 }
 0x449   : > { %v4866_v19 = vadd.s32 %v1627_v62, %v1619_v12 }
 0x454   : > { %v1523_v42 = vpop.permute.xlu1 %1522 }
 0x455   : > { %vm1541_vm6 = vcmp.gt.f32.partialorder %v1523_v42, %v4716_v2  ;;  %vm1557_vm11 = vcmp.eq.f32.partialorder %v1523_v42, %v4716_v2 }
 0x456   : > { %vm1589_vm3 = vmand %vm1557_vm11, %vm5179_vm13 }
 0x457   : > { %vm1605_vm7 = vmor %vm1541_vm6, %vm1589_vm3 }
 0x458   : > { %v1621_v53 = vsel %vm1605_vm7, 1, %v5279_v43 }
 0x459   : > { %v4879_v9 = vadd.s32 %v1629_v11, %v1621_v53 }
 0x469   : > { %v2488_v35 = vpop.trf.xlu2 }
 0x46a   : > { %2506 = vperm.xlu1 %2996, %v2488_v35  }
 0x471   : > { %v2489_v60 = vpop.trf.xlu2 }
 0x472   : > { %2511 = vperm.xlu1 %2996, %v2489_v60  }
 0x479   : > { %v2490_v30 = vpop.trf.xlu2 }
 0x47a   : > { %2516 = vperm.xlu1 %2996, %v2490_v30  }
 0x481   : > { %v2491_v10 = vpop.trf.xlu2 }
 0x482   : > { %2521 = vperm.xlu1 %2996, %v2491_v10  }
 0x489   : > { %v2492_v16 = vpop.trf.xlu2 }
 0x491   : > { %v2493_v24 = vpop.trf.xlu2 }
 0x492   : > { %2531 = vperm.xlu1 %2996, %v2493_v24  }
 0x499   : > { %v2494_v31 = vpop.trf.xlu2 }
 0x49a   : > { %2536 = vperm.xlu1 %2996, %v2494_v31  }
 0x4a1   : > { %v2495_v27 = vpop.trf.xlu2 }
 0x4a2   : > { %2541 = vperm.xlu1 %2996, %v2495_v27  }
 0x4a9   : > { %v2496_v3 = vpop.trf.xlu2 }
 0x4aa   : > { %2546 = vperm.xlu1 %2996, %v2496_v3  }
 0x4b1   : > { %1497 = vperm.xlu2 %2997, %v4687_v63   ;;  %v2497_v14 = vpop.trf.xlu2 }
 0x4b2   : > { %2551 = vperm.xlu1 %2996, %v2497_v14  }
 0x4b9   : > { %1507 = vperm.xlu2 %2997, %v4692_v33   ;;  %v2498_v61 = vpop.trf.xlu2 }
 0x4ba   : > { %2556 = vperm.xlu1 %2996, %v2498_v61   ;;  %v1645_v61 = vperm.slane %v4645_v17, 0 }
 0x4c1   : > { %1517 = vperm.xlu2 %2997, %v4713_v0   ;;  %v2499_v54 = vpop.trf.xlu2 }
 0x4c2   : > { %2561 = vperm.xlu1 %2996, %v2499_v54  }
 0x4c9   : > { %2526 = vperm.xlu2 %2997, %v2492_v16   ;;  %v2500_v8 = vpop.trf.xlu2 }
 0x4ca   : > { %2566 = vperm.xlu1 %2996, %v2500_v8  }
 0x4d1   : > { %v2501_v45 = vpop.trf.xlu2 }
 0x4d2   : > { %2571 = vperm.xlu1 %2996, %v2501_v45  }
 0x4d9   : > { %v2502_v48 = vpop.trf.xlu2 }
 0x4da   : > { %2576 = vperm.xlu1 %2996, %v2502_v48  }
 0x4dc   : > { %v4884_v1 = vpop.permute.xlu1 %2506 }
 0x4e1   : > { %v2503_v63 = vpop.trf.xlu2 }
 0x4e2   : > { %2581 = vperm.xlu1 %2996, %v2503_v63  }
 0x4e4   : > { %v2512_v23 = vpop.permute.xlu1 %2511 }
 0x4e5   : > { %vm2602_vm5 = vcmp.eq.f32.partialorder %v2512_v23, %v4889_v21  ;;  %vm2586_vm12 = vcmp.gt.f32.partialorder %v2512_v23, %v4889_v21 }
 0x4e6   : > { %vm2618_vm6 = vmand %vm2602_vm5, %vm1559_vm4 }
 0x4e7   : > { %vm2634_vm11 = vmor %vm2586_vm12, %vm2618_vm6  ;;  %vm5185_vm12 = vcmp.lt.s32.totalorder %v4903_v5, %v4639_v4 }
 0x4e8   : > { %v2650_v18 = vsel %vm2634_vm11, 1, %v5279_v43 }
 0x4ec   : > { %v2517_v36 = vpop.permute.xlu1 %2516 }
 0x4ed   : > { %vm2603_vm13 = vcmp.eq.f32.partialorder %v2517_v36, %v4889_v21  ;;  %vm2587_vm4 = vcmp.gt.f32.partialorder %v2517_v36, %v4889_v21 }
 0x4ee   : > { %vm2619_vm5 = vmand %vm2603_vm13, %vm1560_vm1 }
 0x4f4   : > { %v4886_v33 = vpop.permute.xlu1 %2521 }
 0x504   : > { %v2532_v0 = vpop.permute.xlu1 %2531 }
 0x505   : > { %vm2590_vm3 = vcmp.gt.f32.partialorder %v2532_v0, %v4889_v21  ;;  %vm2606_vm7 = vcmp.eq.f32.partialorder %v2532_v0, %v4889_v21 }
 0x506   : > { %vm2622_vm0 = vmand %vm2606_vm7, %vm1563_vm2 }
 0x507   : > { %vm2638_vm15 = vmor %vm2590_vm3, %vm2622_vm0  ;;  %vm5288_vm3 = vcmp.lt.s32.totalorder %v4768_v56, %v4639_v4  ;;  %v4944_v56 = vadd.s32 112, %v4708_v6 }
 0x508   : > { %v2654_v28 = vsel %vm2638_vm15, 1, %v5279_v43  ;;  %vm2635_vm2 = vmor %vm2587_vm4, %vm2619_vm5  ;;  %vm5186_vm5 = vcmp.lt.s32.totalorder %v4923_v41, %v4639_v4 }
 0x509   : > { %v4911_v7 = vadd.s32 %v2654_v28, %v2650_v18  ;;  %v2651_v47 = vsel %vm2635_vm2, 1, %v5279_v43  ;;  %vm5184_vm2 = vcmp.lt.s32.totalorder %v4944_v56, %v4639_v4 }
 0x50b   : > { %v1498_v39 = vpop.permute.xlu2 %1497 }
 0x50c   : > { %vm1536_vm6 = vcmp.gt.f32.partialorder %v1498_v39, %v4716_v2  ;;  %vm1552_vm0 = vcmp.eq.f32.partialorder %v1498_v39, %v4716_v2  ;;  %v2537_v40 = vpop.permute.xlu1 %2536 }
 0x50d   : > { %vm1584_vm15 = vmand %vm1552_vm0, %vm5185_vm12  ;;  %vm2591_vm11 = vcmp.gt.f32.partialorder %v2537_v40, %v4889_v21  ;;  %vm2607_vm1 = vcmp.eq.f32.partialorder %v2537_v40, %v4889_v21 }
 0x50e   : > { %vm1600_vm13 = vmor %vm1536_vm6, %vm1584_vm15 }
 0x50f   : > { %v1616_v44 = vsel %vm1600_vm13, 1, %v5279_v43  ;;  %vm2623_vm7 = vmand %vm2607_vm1, %vm5288_vm3 }
 0x510   : > { %v1628_v20 = vadd.s32 %v4779_v55, %v1616_v44  ;;  %vm2639_vm4 = vmor %vm2591_vm11, %vm2623_vm7 }
 0x511   : > { %v2655_v59 = vsel %vm2639_vm4, 1, %v5279_v43 }
 0x512   : > { %v4932_v46 = vadd.s32 %v2655_v59, %v2651_v47 }
 0x513   : > { %v1508_v49 = vpop.permute.xlu2 %1507 }
 0x514   : > { %vm1538_vm6 = vcmp.gt.f32.partialorder %v1508_v49, %v4716_v2  ;;  %vm1554_vm0 = vcmp.eq.f32.partialorder %v1508_v49, %v4716_v2  ;;  %v4938_v62 = vpop.permute.xlu1 %2541 }
 0x515   : > { %vm1586_vm15 = vmand %vm1554_vm0, %vm5186_vm5  ;;  %vm5183_vm0 = vcmp.eq.s32.totalorder %v4708_v6, 1 }
 0x516   : > { %vm1602_vm11 = vmor %vm1538_vm6, %vm1586_vm15  ;;  %vm5182_vm15 = vcmp.eq.s32.totalorder %v4708_v6, 0 }
 0x517   : > { %v1618_v55 = vsel %vm1602_vm11, 1, %v5279_v43  ;;  %vm2601_vm11 = vcmp.eq.f32.partialorder %v4884_v1, %v4889_v21 }
 0x518   : > { %v1630_v37 = vadd.s32 %v4836_v22, %v1618_v55 }
 0x51a   : > { %v1634_v13 = vadd.s32 %v4866_v19, %v1630_v37 }
 0x51b   : > { %v1518_v11 = vpop.permute.xlu2 %1517 }
 0x51c   : > { %vm1540_vm1 = vcmp.gt.f32.partialorder %v1518_v11, %v4716_v2  ;;  %vm1556_vm13 = vcmp.eq.f32.partialorder %v1518_v11, %v4716_v2  ;;  %v2547_v25 = vpop.permute.xlu1 %2546 }
 0x51d   : > { %vm1588_vm3 = vmand %vm1556_vm13, %vm5184_vm2  ;;  %vm2593_vm5 = vcmp.gt.f32.partialorder %v2547_v25, %v4889_v21 }
 0x51e   : > { %vm1604_vm7 = vmor %vm1540_vm1, %vm1588_vm3  ;;  %vm2585_vm1 = vcmp.gt.f32.partialorder %v4884_v1, %v4889_v21 }
 0x51f   : > { %v1620_v22 = vsel %vm1604_vm7, 1, %v5279_v43  ;;  %vm2617_vm13 = vmand %vm2601_vm11, %vm1558_vm10  ;;  %vm5289_vm7 = vcmp.lt.s32.totalorder %v4733_v15, %v4639_v4 }
 0x520   : > { %v1632_v12 = vadd.s32 %v1628_v20, %v1620_v22 }
 0x522   : > { %v1635_v42 = vadd.s32 %v4879_v9, %v1632_v12  ;;  %v3083_v9 = vmov 0.0  }
 0x523   : > { %v2527_v31 = vpop.permute.xlu2 %2526 }
 0x524   : > { %v2552_v53 = vpop.permute.xlu1 %2551  ;;  %v1636_v19 = vadd.s32 %v1635_v42, %v1634_v13  ;;  %vm2589_vm3 = vcmp.gt.f32.partialorder %v2527_v31, %v4889_v21  ;;  %v2688_v13 = vperm.slane %v4690_v29, 0 }
 0x525   : > { %vm2594_vm10 = vcmp.gt.f32.partialorder %v2552_v53, %v4889_v21 }
 0x526   : > { %v1637_v35 = vrot.slane %v1636_v19, 4 }
 0x528   : > { %v1638_v60 = vadd.s32 %v1637_v35, %v1636_v19 }
 0x52a   : > { %v1639_v30 = vrot.slane %v1638_v60, 2 }
 0x52c   : > { %v4958_v10 = vpop.permute.xlu1 %2556  ;;  %v1640_v2 = vadd.s32 %v1639_v30, %v1638_v60 }
 0x52e   : > { %v1641_v16 = vrot.slane %v1640_v2, 1 }
 0x530   : > { %v1642_v24 = vadd.s32 %v1641_v16, %v1640_v2 }
 0x532   : > { %vm1643_vm4 = vcmp.lt.s32.totalorder %v1642_v24, 4 }
 0x533   : > { %vm1644_vm6 = vmand %vm1643_vm4, %vm4651_vm8  ;;  %vm2605_vm8 = vcmp.eq.f32.partialorder %v2527_v31, %v4889_v21 }
 0x534   : > { %v4965_v27 = vpop.permute.xlu1 %2561  ;;  %v2919_v3 = vsel %vm1644_vm6, 1.0, %v3083_v9  ;;  %vm2621_vm4 = vmand %vm2605_vm8, %vm5289_vm7  ;;  %vm2610_vm6 = vcmp.eq.f32.partialorder %v2552_v53, %v4889_v21  ;;  %vm5290_vm8 = vcmp.lt.s32.totalorder %v4801_v26, %v4639_v4 }
 0x535   : > { %v1648_v14 = vperm.slane %v2919_v3, 0  ;;  %vm2637_vm2 = vmor %vm2589_vm3, %vm2621_vm4 }
 0x536   : > { %vm2626_vm11 = vmand %vm2610_vm6, %vm1567_vm9  ;;  %v2653_v15 = vsel %vm2637_vm2, 1, %v5279_v43 }
 0x537   : > { %v1651_v52 = vsel %vm5183_vm0, %v1648_v14, 0.0  ;;  %vm2609_vm0 = vcmp.eq.f32.partialorder %v2547_v25, %v4889_v21  ;;  %vm2642_vm4 = vmor %vm2594_vm10, %vm2626_vm11  ;;  %vm2588_vm11 = vcmp.gt.f32.partialorder %v4886_v33, %v4889_v21 }
 0x538   : > { %v1652_v54 = vsel %vm5182_vm15, %v1645_v61, %v1651_v52  ;;  %vm2633_vm15 = vmor %vm2585_vm1, %vm2617_vm13  ;;  %vm5291_vm13 = vcmp.lt.s32.totalorder %v4923_v41, %v4639_v4  ;;  %v2658_v45 = vsel %vm2642_vm4, 1, %v5279_v43 }
 0x539   : > { %1653 = vst [vmem:[%s4983_s13] sm:$0xff] %v1652_v54  ;;  %vm2625_vm7 = vmand %vm2609_vm0, %vm5290_vm8  ;;  %v2649_v8 = vsel %vm2633_vm15, 1, %v5279_v43  ;;  %vm2604_vm0 = vcmp.eq.f32.partialorder %v4886_v33, %v4889_v21  ;;  %vm2608_vm15 = vcmp.eq.f32.partialorder %v4938_v62, %v4889_v21  ;;  %v2670_v23 = vadd.s32 %v4911_v7, %v2658_v45 }
 0x53a   : > { %vm2641_vm14 = vmor %vm2593_vm5, %vm2625_vm7  ;;  %v2665_v32 = vadd.s32 %v2653_v15, %v2649_v8  ;;  %vm5293_vm8 = vcmp.lt.s32.totalorder %v4711_v58, %v4639_v4  ;;  %vm2611_vm7 = vcmp.eq.f32.partialorder %v4958_v10, %v4889_v21  ;;  %v5295_v33 = vmov 0 }
 0x53b   : > { %v2657_v26 = vsel %vm2641_vm14, 1, %v5279_v43  ;;  %vm2620_vm14 = vmand %vm2604_vm0, %vm5293_vm8  ;;  %vm2595_vm0 = vcmp.gt.f32.partialorder %v4958_v10, %v4889_v21 }
 0x53c   : > { %v2567_v17 = vpop.permute.xlu1 %2566  ;;  %v2669_v63 = vadd.s32 %v2665_v32, %v2657_v26  ;;  %vm5033_vm4 = vmor %vm2588_vm11, %vm2620_vm14 }
 0x53d   : > { %vm2613_vm12 = vcmp.eq.f32.partialorder %v2567_v17, %v4889_v21  ;;  %vm2597_vm1 = vcmp.gt.f32.partialorder %v2567_v17, %v4889_v21  ;;  %v5296_v33 = vsel %vm5033_vm4, 4294967295, %v5295_v33 }
 0x53e   : > { %vm2629_vm3 = vmand %vm2613_vm12, %vm5291_vm13  ;;  %vm5292_vm12 = vcmp.lt.s32.totalorder %v4856_v57, %v4639_v4  ;;  %vm5294_vm13 = vcmp.lt.s32.totalorder %v4796_v38, %v4639_v4 }
 0x53f   : > { %vm2645_vm9 = vmor %vm2597_vm1, %vm2629_vm3  ;;  %vm2592_vm1 = vcmp.gt.f32.partialorder %v4938_v62, %v4889_v21 }
 0x540   : > { %v2661_v1 = vsel %vm2645_vm9, 1, %v5279_v43  ;;  %vm2624_vm3 = vmand %vm2608_vm15, %vm5294_vm13  ;;  %vm2612_vm9 = vcmp.eq.f32.partialorder %v4965_v27, %v4889_v21  ;;  %vm2596_vm15 = vcmp.gt.f32.partialorder %v4965_v27, %v4889_v21  ;;  %vm5299_vm13 = vcmp.lt.s32.totalorder %v4944_v56, %v4639_v4 }
 0x541   : > { %v2673_v57 = vadd.s32 %v2669_v63, %v2661_v1 }
 0x544   : > { %v2572_v48 = vpop.permute.xlu1 %2571 }
 0x545   : > { %vm2598_vm2 = vcmp.gt.f32.partialorder %v2572_v48, %v4889_v21  ;;  %vm2614_vm6 = vcmp.eq.f32.partialorder %v2572_v48, %v4889_v21 }
 0x546   : > { %vm2630_vm5 = vmand %vm2614_vm6, %vm5292_vm12 }
 0x547   : > { %vm2646_vm10 = vmor %vm2598_vm2, %vm2630_vm5  ;;  %vm5297_vm2 = vcmp.lt.s32.totalorder %v4903_v5, %v4639_v4 }
 0x548   : > { %v2662_v36 = vsel %vm2646_vm10, 1, %v5279_v43  ;;  %vm2627_vm6 = vmand %vm2611_vm7, %vm5297_vm2  ;;  %vm5298_vm10 = vcmp.lt.s32.totalorder %v4845_v50, %v4639_v4 }
 0x549   : > { %v2674_v0 = vadd.s32 %v2670_v23, %v2662_v36  ;;  %vm2640_vm12 = vmor %vm2592_vm1, %vm2624_vm3  ;;  %vm5300_vm1 = vnez %v5296_v33 }
 0x54a   : > { %vm2628_vm11 = vmand %vm2612_vm9, %vm5298_vm10  ;;  %v2656_v38 = vsel %vm2640_vm12, 1, %v5279_v43  ;;  %v2652_v5 = vsel %vm5300_vm1, 1, %v5279_v43  ;;  %vm5303_vm10 = vcmp.eq.s32.totalorder %v4708_v6, 1 }
 0x54b   : > { %v2677_v58 = vadd.s32 %v2674_v0, %v2673_v57  ;;  %vm2643_vm8 = vmor %vm2595_vm0, %vm2627_vm6  ;;  %v2668_v39 = vadd.s32 %v2656_v38, %v2652_v5 }
 0x54c   : > { %v2577_v18 = vpop.permute.xlu1 %2576  ;;  %vm2644_vm2 = vmor %vm2596_vm15, %vm2628_vm11  ;;  %v2659_v28 = vsel %vm2643_vm8, 1, %v5279_v43  ;;  %vm5304_vm11 = vcmp.eq.s32.totalorder %v4708_v6, 0 }
 0x54d   : > { %vm2615_vm5 = vcmp.eq.f32.partialorder %v2577_v18, %v4889_v21  ;;  %vm2599_vm14 = vcmp.gt.f32.partialorder %v2577_v18, %v4889_v21  ;;  %v2660_v50 = vsel %vm2644_vm2, 1, %v5279_v43  ;;  %v2671_v41 = vadd.s32 %v4932_v46, %v2659_v28 }
 0x54e   : > { %vm2631_vm4 = vmand %vm2615_vm5, %vm5299_vm13  ;;  %v2672_v44 = vadd.s32 %v2668_v39, %v2660_v50  ;;  %vm5302_vm5 = vnez %v5281_v34 }
 0x54f   : > { %vm2647_vm7 = vmor %vm2599_vm14, %vm2631_vm4  ;;  %vm5301_vm4 = vcmp.lt.s32.totalorder %v4869_v51, %v4639_v4 }
 0x550   : > { %v2663_v40 = vsel %vm2647_vm7, 1, %v5279_v43 }
 0x551   : > { %v2675_v47 = vadd.s32 %v2671_v41, %v2663_v40 }
 0x554   : > { %v2582_v7 = vpop.permute.xlu1 %2581 }
 0x555   : > { %vm2600_vm3 = vcmp.gt.f32.partialorder %v2582_v7, %v4889_v21  ;;  %vm2616_vm9 = vcmp.eq.f32.partialorder %v2582_v7, %v4889_v21 }
 0x556   : > { %vm2632_vm0 = vmand %vm2616_vm9, %vm5301_vm4 }
 0x557   : > { %vm2648_vm6 = vmor %vm2600_vm3, %vm2632_vm0 }
 0x558   : > { %v2664_v20 = vsel %vm2648_vm6, 1, %v5279_v43 }
 0x559   : > { %v2676_v59 = vadd.s32 %v2672_v44, %v2664_v20 }
 0x55b   : > { %v2678_v49 = vadd.s32 %v2676_v59, %v2675_v47 }
 0x55d   : > { %v2679_v62 = vadd.s32 %v2678_v49, %v2677_v58 }
 0x55f   : > { %v2680_v56 = vrot.slane %v2679_v62, 4 }
 0x561   : > { %v2681_v55 = vadd.s32 %v2680_v56, %v2679_v62 }
 0x563   : > { %v2682_v21 = vrot.slane %v2681_v55, 2 }
 0x565   : > { %v2683_v37 = vadd.s32 %v2682_v21, %v2681_v55 }
 0x567   : > { %v2684_v4 = vrot.slane %v2683_v37, 1 }
 0x569   : > { %v2685_v51 = vadd.s32 %v2684_v4, %v2683_v37 }
 0x56b   : > { %vm2686_vm12 = vcmp.lt.s32.totalorder %v2685_v51, 4 }
 0x56c   : > { %vm2687_vm15 = vmand %vm2686_vm12, %vm5302_vm5 }
 0x56d   : > { %v2924_v43 = vsel %vm2687_vm15, 1.0, %v3083_v9 }
 0x56e   : > { %v2691_v46 = vperm.slane %v2924_v43, 0 }
 0x570   : > { %v2692_v11 = vsel %vm5303_vm10, %v2691_v46, 0.0 }
 0x571   : > { %v2693_v25 = vsel %vm5304_vm11, %v2688_v13, %v2692_v11 }
 0x572   : > { %2925 = vst [vmem:[%s4983_s13 + $0x8] sm:$0xff] %v2693_v25 }
 0x573   : > { %3041 = shalt.err (!%p3038_p4)
}
 0x574   : > { %s3084_s10 = smov 128   ;;  %s3085_s11 = smov 8  }
 0x575   : > { %2950 = dma.vmem_to_hbm [thread:$0]  (%p3157_p5), %s2715_s18, 256, %s2717_s19, %s2697_s0, %s3084_s10, %s3084_s10, %s3085_s11  }
 0x576 PF: > { %p2956_p7 = scmp.ge.s32.totalorder %s3078_s25, 2  ;;  %s2735_s12 = sand.u32 1, %s3066_s22  }
 0x577   : > { %s2736_s13 = scalar_lea.sflag [#allocation5], %s2735_s12 }
 0x578   : > { %p2953_p8 = pnand %p2956_p7, %p3161_p6 }
 0x57a   : > { %p2954_p9 = pneg %p2953_p8 }
 0x57c   : > { %3061 = dma.done.wait (%p2954_p9), %s2736_s13, 256  }
 0x57d   : > { %3063 = vsyncadd (%p2954_p9), %s2736_s13, 4294967040  ;;  %p24_p10 = scmp.ge.s32.totalorder %s3144_s27, 4   ;;  %s5305_s22 = smov %s3070_s23 }
 0x57e   : > { %s5306_s23 = smov %s3074_s24  ;;  %s5307_s24 = smov %s3155_s30 }
 0x57f   : > { %s5308_s25 = smov %s3144_s27  ;;  %26 = sbr.rel (!%p24_p10) target bundleno = 9 (0x9), region = 84 }
 0x584   :  { %2750 = vsyncpa [#allocation5], 1 }
 0x585   :  { %2752 = vsyncpa [#allocation5 + $0x1], 1 }

</bundles_post_ra>
